<compile_context>
chip_gen: v7x
topology: tpu7x:2x2x1
jax: 0.10.0
libtpu: 0.0.40
codegen_flags: <defaults>
</compile_context>

<pallas_src>
import functools

import jax
import jax.numpy as jnp
from jax.experimental import pallas as pl
from jax.experimental.pallas import tpu as pltpu


def _round_up(v, m):
    return ((v + m - 1) // m) * m


def attn_agg_kernel(x_ref, oh_ref, wcat_ref, w2_ref,
                    acc_out_ref, m_out_ref, m_acc, acc, *, hid_p):
    t = pl.program_id(1)
    g_p = acc.shape[0]

    @pl.when(t == 0)
    def _init():
        m_acc[...] = jnp.full_like(m_acc, -1e30)
        acc[...] = jnp.zeros_like(acc)

    x = x_ref[...]                                   # (TN, C_in_p) bf16, ones column == 1
    hit = oh_ref[...]                                # (TN, G_p)    bf16 one-hot (0 rows = pad)

    # ---- single fused MXU matmul: [gate hidden | transform + denominator], biases folded.
    hx = jnp.dot(x, wcat_ref[...], preferred_element_type=jnp.float32)
    hx = jnp.maximum(hx, 0.0)                        # ReLU for both halves (den col stays 1)
    h = hx[:, :hid_p]                                # (TN, hid_p)   gate hidden (b2 col == 1)
    xt = hx[:, hid_p:]                               # (TN, C_aug_p) transform (+ ones den col)

    # ---- gate head: (hid -> 1) on the VPU; b2 rides the constant gate column of w2row.
    # TODO(synk): dropout (p=0.1) inside gate_nn treated as identity (inference mode).
    gate = jnp.sum(h * w2_ref[...], axis=-1, keepdims=True)          # (TN, 1) f32

    # ---- online segment softmax
    hit_f = hit.astype(jnp.float32)
    masked = jnp.where(hit_f > 0.0, gate, jnp.float32(-1e30))        # (TN, G_p)
    tile_max = jnp.max(masked, axis=0, keepdims=True)                # (1, G_p)
    m_new = jnp.maximum(m_acc[...], tile_max)                        # (1, G_p)
    scale = jnp.exp(m_acc[...] - m_new)                              # (1, G_p) in [0, 1]
    m_acc[...] = m_new

    node_m = jnp.sum(hit_f * m_new, axis=1, keepdims=True)           # (TN, 1) = m_new[idx]
    valid = jnp.sum(hit_f, axis=1, keepdims=True)                    # 1 real node / 0 padding
    p = jnp.exp(gate - node_m) * valid                               # (TN, 1), <= 1

    # (1, G_p) row -> (G_p, 1) column: diag-extract on the VPU/XLU only (no MXU matmul).
    rr = jax.lax.broadcasted_iota(jnp.int32, (g_p, g_p), 0)
    cc = jax.lax.broadcasted_iota(jnp.int32, (g_p, g_p), 1)
    scale_col = jnp.sum(jnp.where(rr == cc, scale, 0.0), axis=1, keepdims=True)

    # ---- fused scatter: ONE MXU op accumulates sum(p*xt) and (ones column) sum(p).
    payload = (p * xt).astype(jnp.bfloat16)                          # (TN, C_aug_p)
    contrib = jax.lax.dot_general(hit, payload, (((0,), (0,)), ((), ())),
                                  preferred_element_type=jnp.float32)  # (G_p, C_aug_p)
    acc[...] = acc[...] * scale_col + contrib

    @pl.when(t == pl.num_programs(1) - 1)
    def _finalize():
        acc_out_ref[...] = acc[...]
        m_out_ref[...] = m_acc[...]


def attentional_graph_aggregation(x, index, params, dim_size, *,
                                  tile_n=2048, num_node_splits=2):
    """x: (N, C_in) f32, index: (N,) int32 -> (dim_size, C_out) f32."""
    n, c_in = x.shape
    hid = params["w1"].shape[1]
    c_out = params["wt"].shape[1]

    c_in_p = _round_up(c_in + 1, 128)     # +1: constant-1 input column (bias fold)
    hid_p = _round_up(hid + 1, 128)       # +1: constant gate column (b2 fold)
    c_aug_p = _round_up(c_out + 1, 128)   # +1: fused softmax-denominator column
    g_p = _round_up(max(dim_size, 1), 8)
    w_cols = hid_p + c_aug_p

    ones_col = c_in     # constant-1 input column
    b2_col = hid        # gate column wired to 1 (carries b2 through w2row)
    den_col = c_out     # transform column carrying the softmax denominator

    # Node tiling: clamp to the node count, split across num_node_splits so each
    # TensorCore (v7x) streams an independent node range.  tile_n is the primary knob;
    # at these channel widths a tile costs only a few MiB of VMEM, so even v7x's 64 MiB
    # budget allows multi-thousand-row tiles.
    tile = max(8, _round_up(min(tile_n, _round_up(n, 8)), 8))
    tiles_per_split = max(1, -(-n // (tile * num_node_splits)))
    n_p = num_node_splits * tiles_per_split * tile

    # ---- pack operands: bf16 for MXU operands, f32 accumulation in-kernel.
    xp = jnp.zeros((n_p, c_in_p), jnp.bfloat16)
    xp = xp.at[:n, :c_in].set(x.astype(jnp.bfloat16))
    xp = xp.at[:, ones_col].set(1.0)

    ohp = jnp.zeros((n_p, g_p), jnp.bfloat16)
    ohp = ohp.at[:n].set(jax.nn.one_hot(index, g_p, dtype=jnp.bfloat16))

    w_cat = jnp.zeros((c_in_p, w_cols), jnp.float32)
    w_cat = w_cat.at[:c_in, :hid].set(params["w1"])
    w_cat = w_cat.at[ones_col, :hid].set(params["b1"][0])
    w_cat = w_cat.at[ones_col, b2_col].set(1.0)
    w_cat = w_cat.at[:c_in, hid_p:hid_p + c_out].set(params["wt"])
    w_cat = w_cat.at[ones_col, hid_p:hid_p + c_out].set(params["bt"][0])
    w_cat = w_cat.at[ones_col, hid_p + den_col].set(1.0)
    w_cat = w_cat.astype(jnp.bfloat16)

    w2row = jnp.zeros((1, hid_p), jnp.float32)
    w2row = w2row.at[0, :hid].set(params["w2"][:, 0])
    w2row = w2row.at[0, b2_col].set(params["b2"][0, 0])

    node_block = lambda c, t: (c * tiles_per_split + t, 0)
    const_block = lambda c, t: (0, 0)

    kernel = functools.partial(attn_agg_kernel, hid_p=hid_p)

    acc_parts, m_parts = pl.pallas_call(
        kernel,
        out_shape=(
            jax.ShapeDtypeStruct((num_node_splits, g_p, c_aug_p), jnp.float32),
            jax.ShapeDtypeStruct((num_node_splits, 1, g_p), jnp.float32),
        ),
        grid_spec=pltpu.PrefetchScalarGridSpec(
            num_scalar_prefetch=0,
            grid=(num_node_splits, tiles_per_split),
            in_specs=[
                pl.BlockSpec((tile, c_in_p), node_block),      # x node tile (streams)
                pl.BlockSpec((tile, g_p), node_block),         # precomputed one-hot tile
                pl.BlockSpec((c_in_p, w_cols), const_block),   # fused weights (resident)
                pl.BlockSpec((1, hid_p), const_block),         # gate head row (resident)
            ],
            out_specs=[
                pl.BlockSpec((None, g_p, c_aug_p), lambda c, t: (c, 0, 0)),  # per-split acc
                pl.BlockSpec((None, 1, g_p), lambda c, t: (c, 0, 0)),        # per-split max
            ],
            scratch_shapes=[
                pltpu.VMEM((1, g_p), jnp.float32),         # running per-group max
                pltpu.VMEM((g_p, c_aug_p), jnp.float32),   # fused num+den accumulator
            ],
        ),
        compiler_params=pltpu.CompilerParams(
            dimension_semantics=("parallel", "arbitrary"),
            # Fits v7x's 64 MiB VMEM with headroom; raise toward ~96 MiB on v5e/v6e when
            # sweeping tile_n higher.
            vmem_limit_bytes=48 * 1024 * 1024,
        ),
        # TODO(synk): at production widths mark the resident weight specs with
        # pipeline_mode=pl.Buffered(1) (halves weight VMEM) and raise the x spec to
        # Buffered(3) if profiling still shows exposed DMA after enlarging tile_n.
    )(xp, ohp, w_cat, w2row)

    # ---- merge per-split online-softmax partials (tiny, plain XLA) and normalize.
    m_all = jnp.max(m_parts, axis=0)                              # (1, G_p)
    corr = jnp.exp(m_parts - m_all[None])                         # (S, 1, G_p)
    corr = jnp.swapaxes(corr, 1, 2)                               # (S, G_p, 1)
    acc_tot = jnp.sum(acc_parts * corr, axis=0)                   # (G_p, C_aug_p)
    den = acc_tot[:, den_col:den_col + 1]                         # sum(exp) per group
    out = acc_tot[:, :c_out] / (den + 1e-16)
    return out[:dim_size]


def init_params(key, in_channels, out_channels):
    hid = in_channels // 2
    k = jax.random.split(key, 6)
    s1 = 1.0 / jnp.sqrt(in_channels)
    s2 = 1.0 / jnp.sqrt(hid)
    return {
        # stored as (in_features, out_features) so the math is x @ W + b
        "w1": jax.random.uniform(k[0], (in_channels, hid), jnp.float32, -s1, s1),
        "b1": jax.random.uniform(k[1], (1, hid), jnp.float32, -s1, s1),
        "w2": jax.random.uniform(k[2], (hid, 1), jnp.float32, -s2, s2),
        "b2": jax.random.uniform(k[3], (1, 1), jnp.float32, -s2, s2),
        "wt": jax.random.uniform(k[4], (in_channels, out_channels), jnp.float32, -s1, s1),
        "bt": jax.random.uniform(k[5], (1, out_channels), jnp.float32, -s1, s1),
    }


def reference(x, index, params, dim_size):
    h = jnp.maximum(x @ params["w1"] + params["b1"], 0.0)
    gate = (h @ params["w2"] + params["b2"])[:, 0]                 # (N,)
    xt = jnp.maximum(x @ params["wt"] + params["bt"], 0.0)         # (N, C_out)
    seg_max = jax.ops.segment_max(gate, index, num_segments=dim_size)
    seg_max = jnp.where(jnp.isfinite(seg_max), seg_max, 0.0)
    e = jnp.exp(gate - seg_max[index])
    den = jax.ops.segment_sum(e, index, num_segments=dim_size)[index] + 1e-16
    alpha = (e / den)[:, None]
    return jax.ops.segment_sum(alpha * xt, index, num_segments=dim_size)


if __name__ == "__main__":
    # Small, deliberately unaligned shapes to exercise padding + the split/tile grid.
    N, C_IN, C_OUT, DIM_SIZE = 200, 48, 40, 6

    key = jax.random.PRNGKey(0)
    kx, ki, kp = jax.random.split(key, 3)
    x = jax.random.normal(kx, (N, C_IN), jnp.float32)
    index = jax.random.randint(ki, (N,), 0, DIM_SIZE, jnp.int32)
    params = init_params(kp, C_IN, C_OUT)

    out = attentional_graph_aggregation(x, index, params, DIM_SIZE,
                                        tile_n=2048, num_node_splits=2)
    out = jax.block_until_ready(out)

    ref = reference(x, index, params, DIM_SIZE)
    assert out.shape == (DIM_SIZE, C_OUT)
    max_err = float(jnp.max(jnp.abs(out - ref)))
    # bf16 MXU operands (incl. folded biases) -> tolerance looser than a pure-f32 kernel.
    assert jnp.allclose(out, ref, atol=1e-2, rtol=1e-2), \
        f"mismatch vs reference (max |err| = {max_err:.3e})"
    print("KERNEL_OK")
</pallas_src>

<mosaic_0001>
module attributes {stable_mosaic.version = 11 : i64} {
  func.func @attn_agg_kernel(%arg0: i32, %arg1: i32, %arg2: memref<200x128xbf16, #tpu.memory_space<vmem>>, %arg3: memref<200x8xbf16, #tpu.memory_space<vmem>>, %arg4: memref<128x256xbf16, #tpu.memory_space<vmem>>, %arg5: memref<1x128xf32, #tpu.memory_space<vmem>>, %arg6: memref<1x8x128xf32, #tpu.memory_space<vmem>>, %arg7: memref<1x1x8xf32, #tpu.memory_space<vmem>>, %arg8: memref<1x8xf32, #tpu.memory_space<vmem>>, %arg9: memref<8x128xf32, #tpu.memory_space<vmem>>) attributes {dimension_semantics = [#tpu.dimension_semantics<parallel>, #tpu.dimension_semantics<arbitrary>], iteration_bounds = array<i64: 2, 1>, scalar_prefetch = 0 : i64, scratch_operands = 2 : i64, tpu.core_type = #tpu.core_type<tc>, window_params = [{transform_indices = @transform_0, window_bounds = array<i64: 200, 128>}, {transform_indices = @transform_1, window_bounds = array<i64: 200, 8>}, {pipeline_mode = #tpu.pipeline_mode<synchronous>, transform_indices = @transform_2, window_bounds = array<i64: 128, 256>}, {pipeline_mode = #tpu.pipeline_mode<synchronous>, transform_indices = @transform_3, window_bounds = array<i64: 1, 128>}, {transform_indices = @transform_4, window_bounds = array<i64: 1, 8, 128>}, {transform_indices = @transform_5, window_bounds = array<i64: 1, 1, 8>}]} {
    %c0_i32 = arith.constant 0 : i32
    %0 = arith.cmpi eq, %arg1, %c0_i32 : i32
    %1 = arith.extui %0 : i1 to i32
    %c0_i32_0 = arith.constant 0 : i32
    %2 = arith.cmpi ne, %1, %c0_i32_0 : i32
    scf.if %2 {
      %cst_30 = arith.constant -1.000000e+30 : f32
      %61 = vector.broadcast %cst_30 : f32 to vector<1x8xf32>
      %c0_31 = arith.constant 0 : index
      %c0_32 = arith.constant 0 : index
      %62 = vector.load %arg8[%c0_31, %c0_32] : memref<1x8xf32, #tpu.memory_space<vmem>>, vector<1x8xf32>
      tpu.vector_store %arg8[%c0_31, %c0_32], %61 {strides = array<i32>} : memref<1x8xf32, #tpu.memory_space<vmem>>, vector<1x8xf32>,
      %cst_33 = arith.constant 0.000000e+00 : f32
      %63 = vector.broadcast %cst_33 : f32 to vector<8x128xf32>
      %c0_34 = arith.constant 0 : index
      %c0_35 = arith.constant 0 : index
      %64 = vector.load %arg9[%c0_34, %c0_35] : memref<8x128xf32, #tpu.memory_space<vmem>>, vector<8x128xf32>
      tpu.vector_store %arg9[%c0_34, %c0_35], %63 {strides = array<i32>} : memref<8x128xf32, #tpu.memory_space<vmem>>, vector<8x128xf32>,
    } else {
    }
    %c0 = arith.constant 0 : index
    %c0_1 = arith.constant 0 : index
    %3 = vector.load %arg2[%c0, %c0_1] : memref<200x128xbf16, #tpu.memory_space<vmem>>, vector<200x128xbf16>
    %c0_2 = arith.constant 0 : index
    %c0_3 = arith.constant 0 : index
    %4 = vector.load %arg3[%c0_2, %c0_3] : memref<200x8xbf16, #tpu.memory_space<vmem>>, vector<200x8xbf16>
    %c0_4 = arith.constant 0 : index
    %c0_5 = arith.constant 0 : index
    %5 = vector.load %arg4[%c0_4, %c0_5] : memref<128x256xbf16, #tpu.memory_space<vmem>>, vector<128x256xbf16>
    %cst = arith.constant dense<0.000000e+00> : vector<200x256xf32>
    %6 = tpu.matmul %3, %5, %cst {dimension_numbers = #tpu.dot_dimension_numbers<[1], [0], [0], [1], [0, 0, 1, 1], [], []>} : vector<200x128xbf16>, vector<128x256xbf16>, vector<200x256xf32> -> vector<200x256xf32>
    %cst_6 = arith.constant 0.000000e+00 : f32
    %7 = vector.broadcast %cst_6 : f32 to vector<200x256xf32>
    %8 = arith.maximumf %6, %7 : vector<200x256xf32>
    %9 = vector.extract_strided_slice %8 {offsets = [0, 0], sizes = [200, 128], strides = [1, 1]} : vector<200x256xf32> to vector<200x128xf32>
    %10 = vector.extract_strided_slice %8 {offsets = [0, 128], sizes = [200, 128], strides = [1, 1]} : vector<200x256xf32> to vector<200x128xf32>
    %c0_7 = arith.constant 0 : index
    %c0_8 = arith.constant 0 : index
    %11 = vector.load %arg5[%c0_7, %c0_8] : memref<1x128xf32, #tpu.memory_space<vmem>>, vector<1x128xf32>
    %12 = vector.broadcast %11 : vector<1x128xf32> to vector<200x128xf32>
    %13 = arith.mulf %9, %12 : vector<200x128xf32>
    %cst_9 = arith.constant dense<0.000000e+00> : vector<200xf32>
    %14 = vector.multi_reduction <add>, %13, %cst_9 [1] : vector<200x128xf32> to vector<200xf32>
    %15 = vector.shape_cast %14 : vector<200xf32> to vector<200x1xf32>
    %16 = arith.extf %4 : vector<200x8xbf16> to vector<200x8xf32>
    %cst_10 = arith.constant 0.000000e+00 : f32
    %17 = vector.broadcast %cst_10 : f32 to vector<200x8xf32>
    %18 = arith.cmpf ogt, %16, %17 : vector<200x8xf32>
    %cst_11 = arith.constant -1.000000e+30 : f32
    %19 = vector.shape_cast %15 : vector<200x1xf32> to vector<200x1xf32>
    %20 = vector.broadcast %19 : vector<200x1xf32> to vector<200x8xf32>
    %21 = vector.broadcast %cst_11 : f32 to vector<200x8xf32>
    %22 = arith.select %18, %20, %21 : vector<200x8xi1>, vector<200x8xf32>
    %cst_12 = arith.constant dense<0xFF800000> : vector<8xf32>
    %23 = vector.multi_reduction <maximumf>, %22, %cst_12 [0] : vector<200x8xf32> to vector<8xf32>
    %24 = vector.shape_cast %23 : vector<8xf32> to vector<1x8xf32>
    %c0_13 = arith.constant 0 : index
    %c0_14 = arith.constant 0 : index
    %25 = vector.load %arg8[%c0_13, %c0_14] : memref<1x8xf32, #tpu.memory_space<vmem>>, vector<1x8xf32>
    %26 = arith.maximumf %25, %24 : vector<1x8xf32>
    %c0_15 = arith.constant 0 : index
    %c0_16 = arith.constant 0 : index
    %27 = vector.load %arg8[%c0_15, %c0_16] : memref<1x8xf32, #tpu.memory_space<vmem>>, vector<1x8xf32>
    %28 = arith.subf %27, %26 : vector<1x8xf32>
    %29 = math.exp %28 : vector<1x8xf32>
    %c0_17 = arith.constant 0 : index
    %c0_18 = arith.constant 0 : index
    %30 = vector.load %arg8[%c0_17, %c0_18] : memref<1x8xf32, #tpu.memory_space<vmem>>, vector<1x8xf32>
    tpu.vector_store %arg8[%c0_17, %c0_18], %26 {strides = array<i32>} : memref<1x8xf32, #tpu.memory_space<vmem>>, vector<1x8xf32>,
    %31 = vector.broadcast %26 : vector<1x8xf32> to vector<200x8xf32>
    %32 = arith.mulf %16, %31 : vector<200x8xf32>
    %cst_19 = arith.constant dense<0.000000e+00> : vector<200xf32>
    %33 = vector.multi_reduction <add>, %32, %cst_19 [1] : vector<200x8xf32> to vector<200xf32>
    %34 = vector.shape_cast %33 : vector<200xf32> to vector<200x1xf32>
    %cst_20 = arith.constant dense<0.000000e+00> : vector<200xf32>
    %35 = vector.multi_reduction <add>, %16, %cst_20 [1] : vector<200x8xf32> to vector<200xf32>
    %36 = vector.shape_cast %35 : vector<200xf32> to vector<200x1xf32>
    %37 = arith.subf %15, %34 : vector<200x1xf32>
    %38 = math.exp %37 : vector<200x1xf32>
    %39 = arith.mulf %38, %36 : vector<200x1xf32>
    %40 = tpu.iota {dimensions = array<i32: 0>} : vector<8x8xi32>
    %41 = tpu.iota {dimensions = array<i32: 1>} : vector<8x8xi32>
    %42 = arith.cmpi eq, %40, %41 : vector<8x8xi32>
    %cst_21 = arith.constant 0.000000e+00 : f32
    %43 = vector.shape_cast %29 : vector<1x8xf32> to vector<1x8xf32>
    %44 = vector.broadcast %43 : vector<1x8xf32> to vector<8x8xf32>
    %45 = vector.broadcast %cst_21 : f32 to vector<8x8xf32>
    %46 = arith.select %42, %44, %45 : vector<8x8xi1>, vector<8x8xf32>
    %cst_22 = arith.constant dense<0.000000e+00> : vector<8xf32>
    %47 = vector.multi_reduction <add>, %46, %cst_22 [1] : vector<8x8xf32> to vector<8xf32>
    %48 = vector.shape_cast %47 : vector<8xf32> to vector<8x1xf32>
    %49 = vector.broadcast %39 : vector<200x1xf32> to vector<200x128xf32>
    %50 = arith.mulf %49, %10 : vector<200x128xf32>
    %51 = arith.truncf %50 : vector<200x128xf32> to vector<200x128xbf16>
    %cst_23 = arith.constant dense<0.000000e+00> : vector<8x128xf32>
    %52 = tpu.matmul %4, %51, %cst_23 {dimension_numbers = #tpu.dot_dimension_numbers<[0], [0], [1], [1], [0, 1, 1, 1], [], []>} : vector<200x8xbf16>, vector<200x128xbf16>, vector<8x128xf32> -> vector<8x128xf32>
    %c0_24 = arith.constant 0 : index
    %c0_25 = arith.constant 0 : index
    %53 = vector.load %arg9[%c0_24, %c0_25] : memref<8x128xf32, #tpu.memory_space<vmem>>, vector<8x128xf32>
    %54 = vector.broadcast %48 : vector<8x1xf32> to vector<8x128xf32>
    %55 = arith.mulf %53, %54 : vector<8x128xf32>
    %56 = arith.addf %55, %52 : vector<8x128xf32>
    %c0_26 = arith.constant 0 : index
    %c0_27 = arith.constant 0 : index
    %57 = vector.load %arg9[%c0_26, %c0_27] : memref<8x128xf32, #tpu.memory_space<vmem>>, vector<8x128xf32>
    tpu.vector_store %arg9[%c0_26, %c0_27], %56 {strides = array<i32>} : memref<8x128xf32, #tpu.memory_space<vmem>>, vector<8x128xf32>,
    %c0_i32_28 = arith.constant 0 : i32
    %58 = arith.cmpi eq, %arg1, %c0_i32_28 : i32
    %59 = arith.extui %58 : i1 to i32
    %c0_i32_29 = arith.constant 0 : i32
    %60 = arith.cmpi ne, %59, %c0_i32_29 : i32
    scf.if %60 {
      %c0_30 = arith.constant 0 : index
      %c0_31 = arith.constant 0 : index
      %61 = vector.load %arg9[%c0_30, %c0_31] : memref<8x128xf32, #tpu.memory_space<vmem>>, vector<8x128xf32>
      %c0_32 = arith.constant 0 : index
      %c0_33 = arith.constant 0 : index
      %c0_34 = arith.constant 0 : index
      %62 = vector.load %arg6[%c0_32, %c0_33, %c0_34] : memref<1x8x128xf32, #tpu.memory_space<vmem>>, vector<1x8x128xf32>
      %63 = vector.shape_cast %62 : vector<1x8x128xf32> to vector<8x128xf32>
      %64 = vector.shape_cast %61 : vector<8x128xf32> to vector<1x8x128xf32>
      tpu.vector_store %arg6[%c0_32, %c0_33, %c0_34], %64 {strides = array<i32>} : memref<1x8x128xf32, #tpu.memory_space<vmem>>, vector<1x8x128xf32>,
      %c0_35 = arith.constant 0 : index
      %c0_36 = arith.constant 0 : index
      %65 = vector.load %arg8[%c0_35, %c0_36] : memref<1x8xf32, #tpu.memory_space<vmem>>, vector<1x8xf32>
      %c0_37 = arith.constant 0 : index
      %c0_38 = arith.constant 0 : index
      %c0_39 = arith.constant 0 : index
      %66 = vector.load %arg7[%c0_37, %c0_38, %c0_39] : memref<1x1x8xf32, #tpu.memory_space<vmem>>, vector<1x1x8xf32>
      %67 = vector.shape_cast %66 : vector<1x1x8xf32> to vector<1x8xf32>
      %68 = vector.shape_cast %65 : vector<1x8xf32> to vector<1x1x8xf32>
      tpu.vector_store %arg7[%c0_37, %c0_38, %c0_39], %68 {strides = array<i32>} : memref<1x1x8xf32, #tpu.memory_space<vmem>>, vector<1x1x8xf32>,
    } else {
    }
    return
  }
  func.func @transform_0(%arg0: i32, %arg1: i32) -> (i32, i32) {
    %c1_i32 = arith.constant 1 : i32
    %0 = arith.muli %arg0, %c1_i32 : i32
    %1 = arith.addi %0, %arg1 : i32
    %c0_i32 = arith.constant 0 : i32
    %c0_i32_0 = arith.constant 0 : i32
    return %1, %c0_i32 : i32, i32
  }
  func.func @transform_1(%arg0: i32, %arg1: i32) -> (i32, i32) {
    %c1_i32 = arith.constant 1 : i32
    %0 = arith.muli %arg0, %c1_i32 : i32
    %1 = arith.addi %0, %arg1 : i32
    %c0_i32 = arith.constant 0 : i32
    %c0_i32_0 = arith.constant 0 : i32
    return %1, %c0_i32 : i32, i32
  }
  func.func @transform_2(%arg0: i32, %arg1: i32) -> (i32, i32) {
    %c0_i32 = arith.constant 0 : i32
    %c0_i32_0 = arith.constant 0 : i32
    %c0_i32_1 = arith.constant 0 : i32
    return %c0_i32, %c0_i32_0 : i32, i32
  }
  func.func @transform_3(%arg0: i32, %arg1: i32) -> (i32, i32) {
    %c0_i32 = arith.constant 0 : i32
    %c0_i32_0 = arith.constant 0 : i32
    %c0_i32_1 = arith.constant 0 : i32
    return %c0_i32, %c0_i32_0 : i32, i32
  }
  func.func @transform_4(%arg0: i32, %arg1: i32) -> (i32, i32, i32) {
    %c0_i32 = arith.constant 0 : i32
    %c0_i32_0 = arith.constant 0 : i32
    %c0_i32_1 = arith.constant 0 : i32
    return %arg0, %c0_i32, %c0_i32_0 : i32, i32, i32
  }
  func.func @transform_5(%arg0: i32, %arg1: i32) -> (i32, i32, i32) {
    %c0_i32 = arith.constant 0 : i32
    %c0_i32_0 = arith.constant 0 : i32
    %c0_i32_1 = arith.constant 0 : i32
    return %arg0, %c0_i32, %c0_i32_0 : i32, i32, i32
  }
}

</mosaic_0001>

<bundles_post_ra>
// kernel: tpu_custom_call.1
= control target key start
LH: loop header
LB: loop body
LE: loop exit
PB: predicated region body
PF: predicated region fallthrough
CT: control target
= control target key end

     0   :  { %11 = vsyncpa [#allocation5], 0  ;;  %s2913_s0 = inlined_call_operand.vmem [shape: bf16[400,128], index: 0, kind: input, shape index: {}]   ;;  %s2914_s1 = inlined_call_operand.vmem [shape: bf16[400,8], index: 1, kind: input, shape index: {}]   ;;  %s2915_s2 = inlined_call_operand.hbm [shape: bf16[128,256], index: 2, kind: input, shape index: {}]   ;;  %s2916_s3 = inlined_call_operand.vmem [shape: f32[1,128], index: 3, kind: input, shape index: {}]   ;;  %s2917_s4 = inlined_call_operand.hbm [shape: f32[2,8,128], index: 4, kind: output, shape index: {0}]   ;;  %s2918_s5 = inlined_call_operand.hbm [shape: f32[2,1,8], index: 5, kind: output, shape index: {1}]  }
   0x1   :  { %12 = vsyncpa [#allocation6], 0 }
   0x2   :  { %14 = vsyncpa [#allocation6 + $0x1], 0 }
   0x3   :  { %15 = vsyncpa [#allocation9], 0 }
   0x4   :  { %17 = vsyncpa [#allocation9 + $0x1], 0  ;;  %s2026_s18 = smov 0   ;;  %s2028_s19 = smov 0  }
   0x5   :  { %s2030_s20 = smov 0   ;;  %s2032_s21 = smov 0  }
   0x6   :  { %s2034_s22 = smov 0   ;;  %s2036_s23 = smov 0  }
   0x7 LB: > { %s1610_s24 = sadd.s32 4294967295, %s1987_s23   ;;  %s1611_s25 = sadd.s32 4294967294, %s1987_s23   ;;  %s1987_s23 = sphi %s2036_s23, %s23_s23   ;;  %s1983_s22 = sphi %s2034_s22, %s3082_s22   ;;  %s1979_s21 = sphi %s2032_s21, %s3081_s21   ;;  %s1975_s20 = sphi %s2030_s20, %s3080_s20   ;;  %s1971_s19 = sphi %s2028_s19, %s3079_s19   ;;  %s1967_s18 = sphi %s2026_s18, %s3078_s18  }
   0x8   : > { %s35_s26 = sadd.s32 1, %s1983_s22  ;;  %s140_s27 = sadd.s32 1, %s1975_s20 }
   0x9   : > { %p37_p0 = scmp.ge.s32.totalorder %s35_s26, 2  ;;  %p150_p1 = scmp.ne.s32.totalorder %s1975_s20, %s1971_s19 }
   0xa   : > { %p151_p2 = scmp.eq.s32.totalorder %s1610_s24, 1  ;;  %p156_p3 = scmp.ne.s32.totalorder %s1971_s19, %s1967_s18 }
   0xb   : > { %s3084_s26 = smov (%p37_p0, %s35_s26), 0  ;;  %p157_p5 = scmp.eq.s32.totalorder %s1611_s25, 1 }
   0xc   : > { %p2066_p4 = por %p151_p2, %p150_p1  ;;  %s137_s29 = ssub.s32 %s1983_s22, %s3084_s26 }
   0xd   : > { %p1612_p6 = scmp.ge.s32.totalorder %s1987_s23, 1  ;;  %p138_p7 = scmp.eq.s32.totalorder %s137_s29, 0 }
   0xe   : > { %s2954_s28 = scalar_select %p2066_p4, 1, 0 }
   0xf   : > { %p2073_p8 = por %p157_p5, %p156_p3  ;;  %p190_p9 = scmp.lt.s32.totalorder %s1987_s23, 3 }
  0x10   : > { %s2079_s6 = scalar_select %p138_p7, %s1975_s20, %s140_s27  }
  0x11   : > { %s2955_s30 = scalar_select %p2073_p8, 1, 0 }
  0x12   : > { %p2081_p10 = pnand %p1612_p6, %p190_p9  ;;  %p2085_p11 = scmp.eq.s32.totalorder %s1610_s24, 0 }
  0x13   : > { %s1989_s9 = smov [#allocation4]   ;;  %s1845_s14 = scalar_lea.hbm %s2915_s2, 2048 }
  0x14   : > { %s2956_s7 = scalar_select %p2081_p10, 1, 0 }
  0x15   : > { %s2957_s8 = scalar_select %p2085_p11, 1, 0 }
  0x16   : > { %p1677_p12 = pneg %p2081_p10  ;;  %s202_s10 = sshll.u32 %s1989_s9, 4  ;;  %s203_s10 = int_to_ptr.vmem [resolvable:$true] %s202_s10 }
  0x17   : > { %p1846_p0 = scmp.ne.s32.totalorder %s2915_s2, %s1845_s14  ;;  %p1852_p5 = scmp.lt.u32.totalorder %s1845_s14, %s2915_s2 }
  0x18   : > { %p2093_p13 = pnand %p2085_p11, %p1677_p12 }
  0x1a   : > { %p1847_p1 = pneg %p2093_p13 }
  0x1c   : > { %p1848_p2 = pnand %p1847_p1, %p1846_p0 }
  0x1e   : > { %p1849_p3 = pneg %p1848_p2 }
  0x20   : > { %p1854_p6 = pnand %p1852_p5, %p1849_p3 }
  0x22   : > { %1857 = shalt.err (!%p1854_p6)
}
  0x23   : > { %s1858_s25 = scalar_lea.vmem %s203_s10, 2048  ;;  %p1866_p8 = scmp.lt.s32.totalorder %s203_s10, %s203_s10 }
  0x24   : > { %p1859_p7 = scmp.ne.s32.totalorder %s203_s10, %s1858_s25  ;;  %p1867_p4 = scmp.lt.s32.totalorder %s1858_s25, %s1858_s25 }
  0x26   : > { %p1861_p9 = pnand %p1859_p7, %p1847_p1  ;;  %p1868_p11 = por %p1867_p4, %p1866_p8 }
  0x28   : > { %p1862_p12 = pneg %p1861_p9 }
  0x2a   : > { %p1869_p10 = pnand %p1868_p11, %p1862_p12 }
  0x2c   : > { %1872 = shalt.err (!%p1869_p10)
}
  0x2d   : > { %s1990_s27 = smov 128   ;;  %s1991_s29 = smov 8  }
  0x2e   : > { %1680 = dma.hbm_to_vmem [thread:$0]  (!%p2093_p13), %s2915_s2, 2048, %s203_s10, [#allocation5], %s1990_s27, %s1990_s27, %s1991_s29  }
  0x2f   : > { %p2959_p0 = scmp.ne.s32.totalorder %s2956_s7, 0 }
  0x31   : > { %243 = sbr.rel (%p2959_p0) target bundleno = 1018 (0x3fa), region = 36 }
  0x38   : > { %p2960_p2 = scmp.ne.s32.totalorder %s2957_s8, 0 }
  0x3a   : > { %1954 = dma.done.wait (%p2960_p2), [#allocation5], 2048  }
  0x3b   : > { %1956 = vsyncadd (%p2960_p2), [#allocation5], 4294965248  ;;  %v2923_v0 = vmov 0   ;;  %s283_s13 = smul.u32 25, %s1979_s21  ;;  %v1744_v1 = vld [vmem:[#allocation4 + $0x4] ss:$8 sps:$4 sm:$0xff]  }
  0x3c   : > { %560 = vmatprep.mubr.bf16.mxu0 %v2923_v0  ;;  %1409 = vmatprep.subr.bf16.mxu1 %v2923_v0  ;;  %v1746_v2 = vld [vmem:[#allocation4] ss:$8 sps:$4 sm:$0xff]   ;;  %v1747_v3 = vld [vmem:[#allocation4 + $0x14] ss:$8 sps:$4 sm:$0xff]   ;;  %v1749_v4 = vld [vmem:[#allocation4 + $0x10] ss:$8 sps:$4 sm:$0xff]  }
  0x3d   : > { %p284_p4 = scmp.lt.s32.totalorder %s283_s13, 49  ;;  %528 = vmatprep.subr.bf16.mxu0 %v1744_v1  ;;  %v1750_v5 = vld [vmem:[#allocation4 + $0x24] ss:$8 sps:$4 sm:$0xff]   ;;  %v1752_v6 = vld [vmem:[#allocation4 + $0x20] ss:$8 sps:$4 sm:$0xff]   ;;  %vm896_vm0 = vcmask 64512  }
  0x3e   : > { %529 = vmatpush1.bf16.msra.mxu0 %v1746_v2  ;;  %v1753_v7 = vld [vmem:[#allocation4 + $0x34] ss:$8 sps:$4 sm:$0xff]   ;;  %v1755_v8 = vld [vmem:[#allocation4 + $0x30] ss:$8 sps:$4 sm:$0xff]   ;;  %v1756_v9 = vld [vmem:[#allocation4 + $0x44] ss:$8 sps:$4 sm:$0xff]  }
  0x3f   : > { %s3086_s13 = smov (!%p284_p4, %s283_s13), 49  ;;  %530 = vmatprep.subr.bf16.mxu0 %v1747_v3  ;;  %v1758_v10 = vld [vmem:[#allocation4 + $0x40] ss:$8 sps:$4 sm:$0xff]   ;;  %v1759_v11 = vld [vmem:[#allocation4 + $0x54] ss:$8 sps:$4 sm:$0xff]   ;;  %vm2925_vm1 = vcmask 57344  }
  0x40   : > { %s1618_s7 = sshll.u32 %s3086_s13, 2  ;;  %v1761_v12 = vld [vmem:[#allocation4 + $0x50] ss:$8 sps:$4 sm:$0xff]   ;;  %v1762_v13 = vld [vmem:[#allocation4 + $0x64] ss:$8 sps:$4 sm:$0xff]   ;;  %s2599_s25 = sand.u32 1, %s1971_s19  }
  0x41   : > { %s2130_s11 = scalar_lea.vmem %s2913_s0, %s1618_s7  ;;  %v1764_v14 = vld [vmem:[#allocation4 + $0x60] ss:$8 sps:$4 sm:$0xff]   ;;  %v1765_v15 = vld [vmem:[#allocation4 + $0x74] ss:$8 sps:$4 sm:$0xff]   ;;  %v1767_v16 = vld [vmem:[#allocation4 + $0x70] ss:$8 sps:$4 sm:$0xff]   ;;  %s2233_s24 = scalar_lea.vmem %s2914_s1, %s1618_s7 }
  0x42   : > { %531 = vmatpush1.bf16.msra.mxu0 %v1749_v4  ;;  %v1768_v17 = vld [vmem:[%s2130_s11] sm:$0xff]   ;;  %v1769_v18 = vld [vmem:[%s2130_s11 + $0x8] sm:$0xff]   ;;  %v1770_v19 = vld [vmem:[%s2130_s11 + $0x10] sm:$0xff]   ;;  %s281_s27 = scalar_lea.vmem [#allocation8], %s2599_s25  ;;  %s1666_s29 = sshll.u32 %s1979_s21, 4 }
  0x43   : > { %532 = vmatprep.subr.bf16.mxu0 %v1750_v5  ;;  %v1771_v20 = vld [vmem:[%s2130_s11 + $0x18] sm:$0xff]   ;;  %v1772_v21 = vld [vmem:[%s2130_s11 + $0x20] sm:$0xff]   ;;  %v1773_v22 = vld [vmem:[%s2130_s11 + $0x28] sm:$0xff]   ;;  %s1491_s9 = sshll.u32 %s281_s27, 4  ;;  %s2840_s7 = scalar_lea.hbm %s2918_s5, %s1666_s29  ;;  %s1492_s9 = int_to_ptr.vmem [resolvable:$true] %s1491_s9 }
  0x44   : > { %v1774_v23 = vld [vmem:[%s2130_s11 + $0x30] sm:$0xff]   ;;  %v1775_v24 = vld [vmem:[%s2130_s11 + $0x38] sm:$0xff]   ;;  %v1776_v25 = vld [vmem:[%s2130_s11 + $0x40] sm:$0xff]   ;;  %s1466_s8 = scalar_lea.sflag [#allocation9], %s2599_s25  ;;  %s1873_s10 = scalar_lea.vmem %s1492_s9, 16 }
  0x45   : > { %v1777_v26 = vld [vmem:[%s2130_s11 + $0x48] sm:$0xff]   ;;  %v1778_v27 = vld [vmem:[%s2130_s11 + $0x50] sm:$0xff]   ;;  %v1779_v28 = vld [vmem:[%s2130_s11 + $0x58] sm:$0xff]   ;;  %p1874_p8 = scmp.ne.s32.totalorder %s1492_s9, %s1873_s10  ;;  %p3076_p10 = scmp.ne.s32.totalorder %s2954_s28, 0 }
  0x46   : > { %533 = vmatpush1.bf16.msra.mxu0 %v1752_v6  ;;  %v1780_v29 = vld [vmem:[%s2130_s11 + $0x60] ss:$0 sps:$4 sm:$0xff]   ;;  %s1994_s11 = smov [#allocation8]  }
  0x47   : > { %534 = vmatprep.subr.bf16.mxu0 %v1753_v7  ;;  %v2160_v31 = vld [vmem:[%s2916_s3] ss:$0 sm:$0xff]  ;;  %p1875_p11 = pnand %p1874_p8, %p3076_p10  ;;  %s1877_s14 = sshll.u32 %s1994_s11, 4  ;;  %s1878_s14 = int_to_ptr.vmem [resolvable:$false] %s1877_s14 }
  0x48   : > { %s1879_s15 = scalar_lea.vmem %s1878_s14, 32  ;;  %p1880_p1 = scmp.lt.s32.totalorder %s1492_s9, %s1878_s14 }
  0x49   : > { %p1876_p13 = pneg %p1875_p11  ;;  %p1881_p3 = scmp.lt.s32.totalorder %s1879_s15, %s1873_s10 }
  0x4a   : > { %535 = vmatpush1.bf16.msra.mxu0 %v1755_v8 }
  0x4b   : > { %536 = vmatprep.subr.bf16.mxu0 %v1756_v9  ;;  %p1882_p5 = por %p1881_p3, %p1880_p1 }
  0x4d   : > { %p1883_p6 = pnand %p1882_p5, %p1876_p13 }
  0x4e   : > { %537 = vmatpush1.bf16.msra.mxu0 %v1758_v10 }
  0x4f   : > { %538 = vmatprep.subr.bf16.mxu0 %v1759_v11 }
  0x52   : > { %539 = vmatpush1.bf16.msra.mxu0 %v1761_v12 }
  0x53   : > { %540 = vmatprep.subr.bf16.mxu0 %v1762_v13 }
  0x56   : > { %541 = vmatpush1.bf16.msra.mxu0 %v1764_v14 }
  0x57   : > { %542 = vmatprep.subr.bf16.mxu0 %v1765_v15 }
  0x5a   : > { %543 = vmatpush1.bf16.msra.mxu0 %v1767_v16 }
  0x5d   : > { %561 = vmatmul.mubr.bf16.vlgmr.msra.gmra.mrb[0].mxu0 %v1768_v17 }
  0x5e   : > { %570 = vmatprep.mubr.bf16.mxu0 %v2923_v0 }
  0x65   : > { %571 = vmatmul.mubr.bf16.gmra.mrb[4].mxu0 %v1769_v18 }
  0x66   : > { %580 = vmatprep.mubr.bf16.mxu0 %v2923_v0 }
  0x6d   : > { %581 = vmatmul.mubr.bf16.gmra.mrb[8].mxu0 %v1770_v19 }
  0x6e   : > { %590 = vmatprep.mubr.bf16.mxu0 %v2923_v0 }
  0x75   : > { %591 = vmatmul.mubr.bf16.gmra.mrb[12].mxu0 %v1771_v20 }
  0x76   : > { %600 = vmatprep.mubr.bf16.mxu0 %v2923_v0 }
  0x7d   : > { %601 = vmatmul.mubr.bf16.gmra.mrb[16].mxu0 %v1772_v21 }
  0x7e   : > { %610 = vmatprep.mubr.bf16.mxu0 %v2923_v0 }
  0x85   : > { %611 = vmatmul.mubr.bf16.gmra.mrb[20].mxu0 %v1773_v22 }
  0x86   : > { %620 = vmatprep.mubr.bf16.mxu0 %v2923_v0 }
  0x8d   : > { %621 = vmatmul.mubr.bf16.gmra.mrb[24].mxu0 %v1774_v23 }
  0x8e   : > { %630 = vmatprep.mubr.bf16.mxu0 %v2923_v0 }
  0x95   : > { %631 = vmatmul.mubr.bf16.gmra.mrb[28].mxu0 %v1775_v24 }
  0x96   : > { %640 = vmatprep.mubr.bf16.mxu0 %v2923_v0 }
  0x9d   : > { %641 = vmatmul.mubr.bf16.gmra.mrb[32].mxu0 %v1776_v25 }
  0x9e   : > { %650 = vmatprep.mubr.bf16.mxu0 %v2923_v0 }
  0xa5   : > { %651 = vmatmul.mubr.bf16.gmra.mrb[36].mxu0 %v1777_v26 }
  0xa6   : > { %660 = vmatprep.mubr.bf16.mxu0 %v2923_v0 }
  0xad   : > { %661 = vmatmul.mubr.bf16.gmra.mrb[40].mxu0 %v1778_v27 }
  0xae   : > { %670 = vmatprep.mubr.bf16.mxu0 %v2923_v0 }
  0xb5   : > { %671 = vmatmul.mubr.bf16.gmra.mrb[44].mxu0 %v1779_v28 }
  0xb6   : > { %680 = vmatprep.mubr.bf16.mxu0 %v2923_v0 }
  0xbd   : > { %681 = vmatmul.mubr.bf16.gmra.mrb[48].mxu0 %v1780_v29 }
 0x130   : > { %v562_v30 = vpop.f32.mrb[0].mxu0 }
 0x131   : > { %v689_v32 = vmax.f32 %v562_v30, 0.0  ;;  %v2162_v33 = vpop.f32.mrb[1].mxu0 }
 0x132   : > { %2961 = vst [vmem:[#allocation13_spill] sm:$0xff] %v2162_v33  ;;  %v566_v34 = vpop.f32.mrb[2].mxu0 }
 0x133   : > { %v691_v35 = vmax.f32 %v566_v34, 0.0  ;;  %v2164_v36 = vpop.f32.mrb[3].mxu0  ;;  %v746_v37 = vmul.f32 %v2160_v31, %v689_v32 }
 0x134   : > { %2962 = vst [vmem:[#allocation14_spill] sm:$0xff] %v2164_v36 }
 0x135   : > { %771 = vadd.xlane.f32.xlu0 %v746_v37  ;;  %v747_v38 = vmul.f32 %v2160_v31, %v691_v35 }
 0x137   : > { %773 = vadd.xlane.f32.xlu1 %v747_v38 }
 0x138   : > { %v572_v39 = vpop.f32.mrb[4].mxu0 }
 0x139   : > { %v693_v40 = vmax.f32 %v572_v39, 0.0  ;;  %v2168_v41 = vpop.f32.mrb[5].mxu0 }
 0x13a   : > { %2963 = vst [vmem:[#allocation15_spill] sm:$0xff] %v2168_v41  ;;  %v576_v42 = vpop.f32.mrb[6].mxu0 }
 0x13b   : > { %v695_v43 = vmax.f32 %v576_v42, 0.0  ;;  %v2170_v44 = vpop.f32.mrb[7].mxu0  ;;  %v748_v45 = vmul.f32 %v2160_v31, %v693_v40 }
 0x13c   : > { %2964 = vst [vmem:[#allocation16_spill] sm:$0xff] %v2170_v44 }
 0x13d   : > { %775 = vadd.xlane.f32.xlu1 %v748_v45  ;;  %v749_v46 = vmul.f32 %v2160_v31, %v695_v43 }
 0x13f   : > { %777 = vadd.xlane.f32.xlu0 %v749_v46 }
 0x140   : > { %v582_v47 = vpop.f32.mrb[8].mxu0 }
 0x141   : > { %v697_v48 = vmax.f32 %v582_v47, 0.0  ;;  %v2174_v49 = vpop.f32.mrb[9].mxu0 }
 0x142   : > { %2965 = vst [vmem:[#allocation17_spill] sm:$0xff] %v2174_v49  ;;  %v586_v50 = vpop.f32.mrb[10].mxu0 }
 0x143   : > { %v699_v51 = vmax.f32 %v586_v50, 0.0  ;;  %v2176_v52 = vpop.f32.mrb[11].mxu0  ;;  %v750_v53 = vmul.f32 %v2160_v31, %v697_v48 }
 0x144   : > { %2966 = vst [vmem:[#allocation18_spill] sm:$0xff] %v2176_v52 }
 0x145   : > { %779 = vadd.xlane.f32.xlu0 %v750_v53  ;;  %v751_v54 = vmul.f32 %v2160_v31, %v699_v51 }
 0x147   : > { %781 = vadd.xlane.f32.xlu1 %v751_v54 }
 0x148   : > { %v592_v55 = vpop.f32.mrb[12].mxu0 }
 0x149   : > { %v701_v56 = vmax.f32 %v592_v55, 0.0  ;;  %v2180_v57 = vpop.f32.mrb[13].mxu0 }
 0x14a   : > { %2967 = vst [vmem:[#allocation19_spill] sm:$0xff] %v2180_v57  ;;  %v596_v58 = vpop.f32.mrb[14].mxu0 }
 0x14b   : > { %v703_v59 = vmax.f32 %v596_v58, 0.0  ;;  %v2182_v60 = vpop.f32.mrb[15].mxu0  ;;  %v752_v61 = vmul.f32 %v2160_v31, %v701_v56 }
 0x14c   : > { %2968 = vst [vmem:[#allocation20_spill] sm:$0xff] %v2182_v60 }
 0x14d   : > { %783 = vadd.xlane.f32.xlu0 %v752_v61  ;;  %v753_v62 = vmul.f32 %v2160_v31, %v703_v59 }
 0x14f   : > { %785 = vadd.xlane.f32.xlu1 %v753_v62 }
 0x150   : > { %v602_v63 = vpop.f32.mrb[16].mxu0 }
 0x151   : > { %v705_v1 = vmax.f32 %v602_v63, 0.0  ;;  %v2186_v2 = vpop.f32.mrb[17].mxu0 }
 0x152   : > { %2969 = vst [vmem:[#allocation21_spill] sm:$0xff] %v2186_v2  ;;  %v606_v3 = vpop.f32.mrb[18].mxu0 }
 0x153   : > { %v707_v4 = vmax.f32 %v606_v3, 0.0  ;;  %v2188_v5 = vpop.f32.mrb[19].mxu0  ;;  %v754_v6 = vmul.f32 %v2160_v31, %v705_v1 }
 0x154   : > { %2970 = vst [vmem:[#allocation22_spill] sm:$0xff] %v2188_v5 }
 0x155   : > { %787 = vadd.xlane.f32.xlu0 %v754_v6  ;;  %v755_v7 = vmul.f32 %v2160_v31, %v707_v4 }
 0x157   : > { %789 = vadd.xlane.f32.xlu1 %v755_v7 }
 0x158   : > { %v612_v8 = vpop.f32.mrb[20].mxu0 }
 0x159   : > { %v709_v9 = vmax.f32 %v612_v8, 0.0  ;;  %v2192_v10 = vpop.f32.mrb[21].mxu0 }
 0x15a   : > { %2971 = vst [vmem:[#allocation23_spill] sm:$0xff] %v2192_v10  ;;  %v616_v11 = vpop.f32.mrb[22].mxu0 }
 0x15b   : > { %v711_v12 = vmax.f32 %v616_v11, 0.0  ;;  %v2194_v13 = vpop.f32.mrb[23].mxu0  ;;  %v756_v14 = vmul.f32 %v2160_v31, %v709_v9 }
 0x15c   : > { %2972 = vst [vmem:[#allocation24_spill] sm:$0xff] %v2194_v13 }
 0x15d   : > { %791 = vadd.xlane.f32.xlu0 %v756_v14  ;;  %v757_v15 = vmul.f32 %v2160_v31, %v711_v12  ;;  %v2241_v12 = vld [vmem:[%s2233_s24] sm:$0xff]  }
 0x15f   : > { %793 = vadd.xlane.f32.xlu1 %v757_v15  ;;  %v2245_v15 = vunpack.c.l.bf16 %v2241_v12 }
 0x160   : > { %v622_v16 = vpop.f32.mrb[24].mxu0 }
 0x161   : > { %v713_v17 = vmax.f32 %v622_v16, 0.0  ;;  %v2198_v18 = vpop.f32.mrb[25].mxu0  ;;  %v2248_v16 = vld [vmem:[%s2233_s24 + $0x8] sm:$0xff]   ;;  %vm846_vm3 = vcmp.gt.f32.partialorder %v2245_v15, 0.0 }
 0x162   : > { %2973 = vst [vmem:[#allocation25_spill] sm:$0xff] %v2198_v18  ;;  %v626_v19 = vpop.f32.mrb[26].mxu0 }
 0x163   : > { %v715_v20 = vmax.f32 %v626_v19, 0.0  ;;  %v2200_v21 = vpop.f32.mrb[27].mxu0  ;;  %v758_v22 = vmul.f32 %v2160_v31, %v713_v17  ;;  %v1065_v19 = vsel %vm896_vm0, %v2245_v15, 0.0 }
 0x164   : > { %2974 = vst [vmem:[#allocation26_spill] sm:$0xff] %v2200_v21 }
 0x165   : > { %795 = vadd.xlane.f32.xlu0 %v758_v22  ;;  %v759_v23 = vmul.f32 %v2160_v31, %v715_v20 }
 0x167   : > { %797 = vadd.xlane.f32.xlu1 %v759_v23 }
 0x168   : > { %v632_v24 = vpop.f32.mrb[28].mxu0 }
 0x169   : > { %v717_v25 = vmax.f32 %v632_v24, 0.0  ;;  %v2204_v26 = vpop.f32.mrb[29].mxu0  ;;  %v2255_v24 = vunpack.c.l.bf16 %v2248_v16 }
 0x16a   : > { %2975 = vst [vmem:[#allocation27_spill] sm:$0xff] %v2204_v26  ;;  %v636_v27 = vpop.f32.mrb[30].mxu0 }
 0x16b   : > { %v719_v28 = vmax.f32 %v636_v27, 0.0  ;;  %v2206_v29 = vpop.f32.mrb[31].mxu0  ;;  %v760_v30 = vmul.f32 %v2160_v31, %v717_v25  ;;  %vm848_vm5 = vcmp.gt.f32.partialorder %v2255_v24, 0.0 }
 0x16c   : > { %2976 = vst [vmem:[#allocation28_spill] sm:$0xff] %v2206_v29 }
 0x16d   : > { %799 = vadd.xlane.f32.xlu0 %v760_v30  ;;  %v761_v32 = vmul.f32 %v2160_v31, %v719_v28  ;;  %v2259_v28 = vld [vmem:[%s2233_s24 + $0x10] sm:$0xff]   ;;  %v2262_v30 = vunpack.c.h.bf16 %v2241_v12 }
 0x16f   : > { %801 = vadd.xlane.f32.xlu1 %v761_v32  ;;  %v1071_v32 = vsel %vm896_vm0, %v2255_v24, 0.0  ;;  %vm847_vm4 = vcmp.gt.f32.partialorder %v2262_v30, 0.0 }
 0x170   : > { %v642_v34 = vpop.f32.mrb[32].mxu0 }
 0x171   : > { %v721_v35 = vmax.f32 %v642_v34, 0.0  ;;  %v2210_v37 = vpop.f32.mrb[33].mxu0  ;;  %v2267_v34 = vunpack.c.l.bf16 %v2259_v28 }
 0x172   : > { %2977 = vst [vmem:[#allocation29_spill] sm:$0xff] %v2210_v37  ;;  %v646_v38 = vpop.f32.mrb[34].mxu0 }
 0x173   : > { %v723_v39 = vmax.f32 %v646_v38, 0.0  ;;  %v2212_v40 = vpop.f32.mrb[35].mxu0  ;;  %v762_v42 = vmul.f32 %v2160_v31, %v721_v35  ;;  %v1068_v35 = vsel %vm896_vm0, %v2262_v30, 0.0  ;;  %v2272_v38 = vld [vmem:[%s2233_s24 + $0x18] sm:$0xff]   ;;  %vm850_vm7 = vcmp.gt.f32.partialorder %v2267_v34, 0.0 }
 0x174   : > { %2978 = vst [vmem:[#allocation30_spill] sm:$0xff] %v2212_v40 }
 0x175   : > { %803 = vadd.xlane.f32.xlu0 %v762_v42  ;;  %v763_v43 = vmul.f32 %v2160_v31, %v723_v39  ;;  %v1077_v39 = vsel %vm896_vm0, %v2267_v34, 0.0  ;;  %v2280_v42 = vunpack.c.l.bf16 %v2272_v38 }
 0x177   : > { %805 = vadd.xlane.f32.xlu1 %v763_v43  ;;  %vm852_vm9 = vcmp.gt.f32.partialorder %v2280_v42, 0.0 }
 0x178   : > { %v652_v45 = vpop.f32.mrb[36].mxu0 }
 0x179   : > { %v725_v46 = vmax.f32 %v652_v45, 0.0  ;;  %v2216_v47 = vpop.f32.mrb[37].mxu0  ;;  %v2285_v45 = vld [vmem:[%s2233_s24 + $0x20] sm:$0xff]  }
 0x17a   : > { %2979 = vst [vmem:[#allocation31_spill] sm:$0xff] %v2216_v47  ;;  %v656_v48 = vpop.f32.mrb[38].mxu0  ;;  %2986 = vst [vmem:[#allocation38_spill] sm:$0xff] %v2285_v45 }
 0x17b   : > { %v727_v50 = vmax.f32 %v656_v48, 0.0  ;;  %v2218_v51 = vpop.f32.mrb[39].mxu0  ;;  %v764_v53 = vmul.f32 %v2160_v31, %v725_v46  ;;  %v2288_v46 = vunpack.c.h.bf16 %v2259_v28  ;;  %v1083_v48 = vsel %vm896_vm0, %v2280_v42, 0.0 }
 0x17c   : > { %2980 = vst [vmem:[#allocation32_spill] sm:$0xff] %v2218_v51 }
 0x17d   : > { %807 = vadd.xlane.f32.xlu0 %v764_v53  ;;  %v765_v54 = vmul.f32 %v2160_v31, %v727_v50  ;;  %v2293_v50 = vunpack.c.l.bf16 %v2285_v45  ;;  %v1080_v53 = vsel %vm896_vm0, %v2288_v46, 0.0  ;;  %vm851_vm8 = vcmp.gt.f32.partialorder %v2288_v46, 0.0 }
 0x17f   : > { %809 = vadd.xlane.f32.xlu1 %v765_v54  ;;  %v2298_v54 = vld [vmem:[%s2233_s24 + $0x28] sm:$0xff]   ;;  %vm854_vm11 = vcmp.gt.f32.partialorder %v2293_v50, 0.0 }
 0x180   : > { %v662_v55 = vpop.f32.mrb[40].mxu0  ;;  %2987 = vst [vmem:[#allocation39_spill] sm:$0xff] %v2298_v54 }
 0x181   : > { %v729_v56 = vmax.f32 %v662_v55, 0.0  ;;  %v2222_v58 = vpop.f32.mrb[41].mxu0  ;;  %v2301_v55 = vunpack.c.h.bf16 %v2272_v38 }
 0x182   : > { %2981 = vst [vmem:[#allocation33_spill] sm:$0xff] %v2222_v58  ;;  %v666_v59 = vpop.f32.mrb[42].mxu0  ;;  %v960_v58 = vlaneseq }
 0x183   : > { %v731_v61 = vmax.f32 %v666_v59, 0.0  ;;  %v2224_v62 = vpop.f32.mrb[43].mxu0  ;;  %v766_v63 = vmul.f32 %v2160_v31, %v729_v56  ;;  %v1089_v56 = vsel %vm896_vm0, %v2293_v50, 0.0  ;;  %v2306_v59 = vunpack.c.l.bf16 %v2298_v54 }
 0x184   : > { %2982 = vst [vmem:[#allocation34_spill] sm:$0xff] %v2224_v62  ;;  %v2409_v62 = vshrl.u32 %v960_v58, 7  ;;  %vm853_vm10 = vcmp.gt.f32.partialorder %v2301_v55, 0.0 }
 0x185   : > { %811 = vadd.xlane.f32.xlu0 %v766_v63  ;;  %v767_v1 = vmul.f32 %v2160_v31, %v731_v61  ;;  %v1086_v61 = vsel %vm896_vm0, %v2301_v55, 0.0  ;;  %v1993_v63 = vmov -1e+30  }
 0x186   : > { %304 = vst.msk [vmem:[#allocation2] sm:$0x1] %vm2925_vm1, %v1993_v63 }
 0x187   : > { %813 = vadd.xlane.f32.xlu1 %v767_v1  ;;  %v2312_v1 = vld [vmem:[%s2233_s24 + $0x30] sm:$0xff]  }
 0x188   : > { %v672_v3 = vpop.f32.mrb[44].mxu0  ;;  %2988 = vst [vmem:[#allocation40_spill] sm:$0xff] %v2312_v1 }
 0x189   : > { %v733_v4 = vmax.f32 %v672_v3, 0.0  ;;  %v2235_v6 = vpop.f32.mrb[45].mxu0  ;;  %v2315_v3 = vunpack.c.h.bf16 %v2285_v45 }
 0x18a   : > { %2983 = vst [vmem:[#allocation35_spill] sm:$0xff] %v2235_v6  ;;  %v676_v7 = vpop.f32.mrb[46].mxu0  ;;  %v2400_v6 = vld [vmem:[%s2233_s24 + $0x60] sm:$0xf] }
 0x18b   : > { %v735_v8 = vmax.f32 %v676_v7, 0.0  ;;  %v2237_v9 = vpop.f32.mrb[47].mxu0  ;;  %v768_v11 = vmul.f32 %v2160_v31, %v733_v4  ;;  %v1095_v4 = vsel %vm896_vm0, %v2306_v59, 0.0  ;;  %v2320_v7 = vunpack.c.l.bf16 %v2312_v1  ;;  %2991 = vst [vmem:[#allocation43_spill] sm:$0xff] %v2400_v6 }
 0x18c   : > { %2984 = vst [vmem:[#allocation36_spill] sm:$0xff] %v2237_v9  ;;  %v2405_v9 = vunpack.c.l.bf16 %v2400_v6 }
 0x18d   : > { %815 = vadd.xlane.f32.xlu0 %v768_v11  ;;  %v769_v14 = vmul.f32 %v2160_v31, %v735_v8  ;;  %v1092_v8 = vsel %vm896_vm0, %v2315_v3, 0.0  ;;  %v2325_v11 = vld [vmem:[%s2233_s24 + $0x38] sm:$0xff]   ;;  %vm858_vm15 = vcmp.gt.f32.partialorder %v2320_v7, 0.0 }
 0x18e   : > { %2989 = vst [vmem:[#allocation41_spill] sm:$0xff] %v2325_v11 }
 0x18f   : > { %817 = vadd.xlane.f32.xlu1 %v769_v14  ;;  %v2328_v14 = vunpack.c.h.bf16 %v2298_v54 }
 0x190   : > { %v682_v17 = vpop.f32.mrb[48].mxu0 }
 0x191   : > { %v737_v20 = vmax.f32 %v682_v17, 0.0  ;;  %v2252_v22 = vpop.f32.mrb[49].mxu0  ;;  %v1101_v17 = vsel %vm896_vm0, %v2320_v7, 0.0 }
 0x192   : > { %2985 = vst [vmem:[#allocation37_spill] sm:$0xff] %v2252_v22  ;;  %v686_v23 = vpop.f32.mrb[50].mxu0 }
 0x193   : > { %v687_v25 = vpop.f32.mrb[51].mxu0  ;;  %v770_v27 = vmul.f32 %v2160_v31, %v737_v20  ;;  %1066 = vadd.xlane.f32.xlu1 %v1065_v19  ;;  %v2275_v31 = vunpack.c.h.bf16 %v2248_v16  ;;  %v2333_v19 = vunpack.c.l.bf16 %v2325_v11  ;;  %v1098_v20 = vsel %vm896_vm0, %v2328_v14, 0.0 }
 0x194   : > { %v2338_v23 = vunpack.c.h.bf16 %v2312_v1 }
 0x195   : > { %819 = vadd.xlane.f32.xlu0 %v770_v27  ;;  %v1074_v43 = vsel %vm896_vm0, %v2275_v31, 0.0  ;;  %v1107_v25 = vsel %vm896_vm0, %v2333_v19, 0.0  ;;  %v2343_v27 = vld [vmem:[%s2233_s24 + $0x40] sm:$0xff]   ;;  %vm849_vm6 = vcmp.gt.f32.partialorder %v2275_v31, 0.0 }
 0x197   : > { %1072 = vadd.xlane.f32.xlu1 %v1071_v32  ;;  %v2346_v32 = vunpack.c.h.bf16 %v2343_v27 }
 0x199   : > { %1069 = vadd.xlane.f32.xlu0 %v1068_v35  ;;  %v1104_v35 = vsel %vm896_vm0, %v2338_v23, 0.0  ;;  %vm863_vm14 = vcmp.gt.f32.partialorder %v2346_v32, 0.0 }
 0x19b   : > { %1078 = vadd.xlane.f32.xlu1 %v1077_v39  ;;  %v2351_v39 = vunpack.c.h.bf16 %v2325_v11 }
 0x19d   : > { %1075 = vadd.xlane.f32.xlu0 %v1074_v43  ;;  %v1116_v43 = vsel %vm896_vm0, %v2346_v32, 0.0  ;;  %vm861_vm12 = vcmp.gt.f32.partialorder %v2351_v39, 0.0 }
 0x19f   : > { %1084 = vadd.xlane.f32.xlu1 %v1083_v48  ;;  %v2356_v48 = vld [vmem:[%s2233_s24 + $0x48] sm:$0xff]  }
 0x1a1   : > { %1081 = vadd.xlane.f32.xlu0 %v1080_v53  ;;  %v2359_v53 = vunpack.c.h.bf16 %v2356_v48 }
 0x1a3   : > { %1090 = vadd.xlane.f32.xlu1 %v1089_v56  ;;  %v1110_v56 = vsel %vm896_vm0, %v2351_v39, 0.0  ;;  %v1122_v63 = vsel %vm896_vm0, %v2359_v53, 0.0  ;;  %vm865_vm2 = vcmp.gt.f32.partialorder %v2359_v53, 0.0 }
 0x1a5   : > { %1087 = vadd.xlane.f32.xlu0 %v1086_v61  ;;  %v2364_v61 = vunpack.c.l.bf16 %v2343_v27 }
 0x1a7   : > { %1096 = vadd.xlane.f32.xlu1 %v1095_v4  ;;  %v2369_v4 = vld [vmem:[%s2233_s24 + $0x50] sm:$0xff]   ;;  %vm862_vm13 = vcmp.gt.f32.partialorder %v2364_v61, 0.0 }
 0x1a8   : > { %v2390_v0 = vunpack.c.l.bf16 %v2369_v4 }
 0x1a9   : > { %1093 = vadd.xlane.f32.xlu0 %v1092_v8  ;;  %v2372_v8 = vunpack.c.h.bf16 %v2369_v4 }
 0x1aa   : > { %v1125_v22 = vsel %vm896_vm0, %v2390_v0, 0.0 }
 0x1ab   : > { %1102 = vadd.xlane.f32.xlu1 %v1101_v17  ;;  %v1113_v17 = vsel %vm896_vm0, %v2364_v61, 0.0 }
 0x1ad   : > { %1099 = vadd.xlane.f32.xlu0 %v1098_v20  ;;  %v2377_v20 = vunpack.c.l.bf16 %v2356_v48 }
 0x1af   : > { %1108 = vadd.xlane.f32.xlu1 %v1107_v25  ;;  %v1128_v25 = vsel %vm896_vm0, %v2372_v8, 0.0  ;;  %vm864_vm1 = vcmp.gt.f32.partialorder %v2377_v20, 0.0 }
 0x1b1   : > { %1105 = vadd.xlane.f32.xlu0 %v1104_v35  ;;  %v2382_v35 = vld [vmem:[%s2233_s24 + $0x58] sm:$0xff]  }
 0x1b2   : > { %2990 = vst [vmem:[#allocation42_spill] sm:$0xff] %v2382_v35 }
 0x1b3   : > { %1117 = vadd.xlane.f32.xlu1 %v1116_v43  ;;  %v2385_v43 = vunpack.c.h.bf16 %v2382_v35 }
 0x1b5   : > { %1111 = vadd.xlane.f32.xlu0 %v1110_v56  ;;  %v1119_v56 = vsel %vm896_vm0, %v2377_v20, 0.0 }
 0x1b7   : > { %1123 = vadd.xlane.f32.xlu1 %v1122_v63  ;;  %v1134_v63 = vsel %vm896_vm0, %v2385_v43, 0.0 }
 0x1b9   : > { %1114 = vadd.xlane.f32.xlu0 %v1113_v17  ;;  %v2397_v17 = vunpack.c.l.bf16 %v2382_v35 }
 0x1bb   : > { %1129 = vadd.xlane.f32.xlu1 %v1128_v25  ;;  %v1131_v25 = vsel %vm896_vm0, %v2397_v17, 0.0 }
 0x1bd   : > { %1120 = vadd.xlane.f32.xlu0 %v1119_v56  ;;  %v1137_v56 = vsel %vm896_vm0, %v2405_v9, 0.0 }
 0x1bf   : > { %1135 = vadd.xlane.f32.xlu1 %v1134_v63  ;;  %v2411_v63 = vand.u32 127, %v960_v58 }
 0x1c1   : > { %1126 = vadd.xlane.f32.xlu0 %v1125_v22 }
 0x1c2   : > { %v2415_v22 = vpop.xlane.xlu0 %771 }
 0x1c3   : > { %2992 = vst [vmem:[#allocation44_spill] sm:$0xff] %v2415_v22  ;;  %v871_v52 = vsel %vm846_vm3, %v2415_v22, -1e+30  ;;  %vm866_vm3 = vcmp.gt.f32.partialorder %v2390_v0, 0.0 }
 0x1c4   : > { %v2417_v47 = vpop.xlane.xlu1 %773 }
 0x1c5   : > { %1132 = vadd.xlane.f32.xlu0 %v1131_v25  ;;  %2993 = vst [vmem:[#allocation45_spill] sm:$0xff] %v2417_v47  ;;  %v872_v44 = vsel %vm847_vm4, %v2417_v47, -1e+30  ;;  %vm867_vm4 = vcmp.gt.f32.partialorder %v2372_v8, 0.0 }
 0x1c9   : > { %1138 = vadd.xlane.f32.xlu0 %v1137_v56 }
 0x1ca   : > { %v2419_v51 = vpop.xlane.xlu1 %775 }
 0x1cb   : > { %2994 = vst [vmem:[#allocation46_spill] sm:$0xff] %v2419_v51  ;;  %v873_v36 = vsel %vm848_vm5, %v2419_v51, -1e+30  ;;  %vm868_vm5 = vcmp.gt.f32.partialorder %v2397_v17, 0.0  ;;  %v898_v51 = vsel %vm896_vm0, %v872_v44, -inf }
 0x1cc   : > { %v2421_v37 = vpop.xlane.xlu0 %777  ;;  %v899_v1 = vsel %vm896_vm0, %v873_v36, -inf }
 0x1cd   : > { %2995 = vst [vmem:[#allocation47_spill] sm:$0xff] %v2421_v37 }
 0x1d2   : > { %v2423_v25 = vpop.xlane.xlu0 %779 }
 0x1d3   : > { %2996 = vst [vmem:[#allocation48_spill] sm:$0xff] %v2423_v25  ;;  %v875_v49 = vsel %vm850_vm7, %v2423_v25, -1e+30  ;;  %v897_v25 = vsel %vm896_vm0, %v871_v52, -inf  ;;  %vm869_vm7 = vcmp.gt.f32.partialorder %v2385_v43, 0.0 }
 0x1d4   : > { %v2425_v40 = vpop.xlane.xlu1 %781  ;;  %v874_v52 = vsel %vm849_vm6, %v2421_v37, -1e+30  ;;  %vm3012_vm6 = vcmp.gt.f32.partialorder %v2328_v14, 0.0 }
 0x1d5   : > { %2997 = vst [vmem:[#allocation49_spill] sm:$0xff] %v2425_v40  ;;  %v876_v41 = vsel %vm851_vm8, %v2425_v40, -1e+30  ;;  %vm3010_vm8 = vcmp.gt.f32.partialorder %v2315_v3, 0.0  ;;  %v900_v36 = vsel %vm896_vm0, %v874_v52, -inf }
 0x1da   : > { %v2427_v56 = vpop.xlane.xlu0 %783 }
 0x1db   : > { %2998 = vst [vmem:[#allocation50_spill] sm:$0xff] %v2427_v56  ;;  %v877_v33 = vsel %vm852_vm9, %v2427_v56, -1e+30  ;;  %v901_v56 = vsel %vm896_vm0, %v875_v49, -inf  ;;  %vm3011_vm9 = vcmp.gt.f32.partialorder %v2306_v59, 0.0 }
 0x1dc   : > { %v2429_v26 = vpop.xlane.xlu1 %785  ;;  %v905_v54 = vsel %vm896_vm0, %v877_v33, -inf }
 0x1dd   : > { %2999 = vst [vmem:[#allocation51_spill] sm:$0xff] %v2429_v26  ;;  %v878_v40 = vsel %vm853_vm10, %v2429_v26, -1e+30  ;;  %v903_v26 = vsel %vm896_vm0, %v876_v41, -inf  ;;  %vm870_vm10 = vcmp.gt.f32.partialorder %v2405_v9, 0.0 }
 0x1de   : > { %v907_v37 = vsel %vm896_vm0, %v878_v40, -inf  ;;  %v904_v33 = vmax.f32 %v898_v51, %v903_v26  ;;  %v906_v40 = vmax.f32 %v899_v1, %v905_v54 }
 0x1df   : > { %v908_v26 = vmax.f32 %v900_v36, %v907_v37 }
 0x1e2   : > { %v2431_v58 = vpop.xlane.xlu0 %787 }
 0x1e3   : > { %3000 = vst [vmem:[#allocation52_spill] sm:$0xff] %v2431_v58  ;;  %v879_v22 = vsel %vm854_vm11, %v2431_v58, -1e+30  ;;  %vm3015_vm11 = vcmp.gt.f32.partialorder %v2338_v23, 0.0 }
 0x1e4   : > { %v2433_v29 = vpop.xlane.xlu1 %789  ;;  %v909_v49 = vsel %vm896_vm0, %v879_v22, -inf }
 0x1e5   : > { %3001 = vst [vmem:[#allocation53_spill] sm:$0xff] %v2433_v29  ;;  %v880_v58 = vsel %vm3010_vm8, %v2433_v29, -1e+30  ;;  %v902_v29 = vmax.f32 %v897_v25, %v901_v56 }
 0x1e6   : > { %v911_v6 = vsel %vm896_vm0, %v880_v58, -inf }
 0x1e7   : > { %v910_v51 = vmax.f32 %v902_v29, %v909_v49  ;;  %v912_v52 = vmax.f32 %v904_v33, %v911_v6 }
 0x1ea   : > { %v2435_v21 = vpop.xlane.xlu0 %791 }
 0x1eb   : > { %3002 = vst [vmem:[#allocation54_spill] sm:$0xff] %v2435_v21  ;;  %v881_v45 = vsel %vm3011_vm9, %v2435_v21, -1e+30 }
 0x1ec   : > { %v2437_v18 = vpop.xlane.xlu1 %793  ;;  %v913_v22 = vsel %vm896_vm0, %v881_v45, -inf }
 0x1ed   : > { %3003 = vst [vmem:[#allocation55_spill] sm:$0xff] %v2437_v18  ;;  %v882_v41 = vsel %vm3012_vm6, %v2437_v18, -1e+30 }
 0x1ee   : > { %v915_v56 = vsel %vm896_vm0, %v882_v41, -inf }
 0x1f2   : > { %v2439_v10 = vpop.xlane.xlu0 %795 }
 0x1f3   : > { %v883_v44 = vsel %vm858_vm15, %v2439_v10, -1e+30  ;;  %vm3016_vm15 = vcmp.gt.f32.partialorder %v2333_v19, 0.0 }
 0x1f4   : > { %v2441_v13 = vpop.xlane.xlu1 %797  ;;  %v917_v58 = vsel %vm896_vm0, %v883_v44, -inf  ;;  %v916_v44 = vmax.f32 %v908_v26, %v915_v56 }
 0x1f5   : > { %v884_v18 = vsel %vm3015_vm11, %v2441_v13, -1e+30 }
 0x1f6   : > { %v919_v29 = vsel %vm896_vm0, %v884_v18, -inf }
 0x1fa   : > { %v2443_v5 = vpop.xlane.xlu0 %799 }
 0x1fb   : > { %3004 = vst [vmem:[#allocation56_spill] sm:$0xff] %v2443_v5  ;;  %v885_v54 = vsel %vm3016_vm15, %v2443_v5, -1e+30 }
 0x1fc   : > { %v2445_v2 = vpop.xlane.xlu1 %801 }
 0x1fd   : > { %3005 = vst [vmem:[#allocation57_spill] sm:$0xff] %v2445_v2  ;;  %v886_v25 = vsel %vm861_vm12, %v2445_v2, -1e+30  ;;  %v914_v2 = vmax.f32 %v906_v40, %v913_v22  ;;  %v918_v40 = vmax.f32 %v910_v51, %v917_v58  ;;  %v921_v22 = vsel %vm896_vm0, %v885_v54, -inf }
 0x1fe   : > { %v923_v37 = vsel %vm896_vm0, %v886_v25, -inf  ;;  %vm3021_vm12 = vcmp.eq.s32.totalorder %v2409_v62, %v2411_v63 }
 0x1ff   : > { %v924_v26 = vmax.f32 %v916_v44, %v923_v37 }
 0x202   : > { %v2462_v57 = vpop.xlane.xlu0 %803 }
 0x203   : > { %3006 = vst [vmem:[#allocation58_spill] sm:$0xff] %v2462_v57  ;;  %v887_v45 = vsel %vm862_vm13, %v2462_v57, -1e+30  ;;  %v920_v57 = vmax.f32 %v912_v52, %v919_v29  ;;  %vm1405_vm13 = vcmask 1043456  }
 0x204   : > { %v2464_v60 = vpop.xlane.xlu1 %805  ;;  %v925_v25 = vsel %vm896_vm0, %v887_v45, -inf  ;;  %v922_v45 = vmax.f32 %v914_v2, %v921_v22 }
 0x205   : > { %3007 = vst [vmem:[#allocation59_spill] sm:$0xff] %v2464_v60  ;;  %v888_v6 = vsel %vm863_vm14, %v2464_v60, -1e+30 }
 0x206   : > { %v927_v56 = vsel %vm896_vm0, %v888_v6, -inf }
 0x207   : > { %v928_v44 = vmax.f32 %v920_v57, %v927_v56  ;;  %v962_v56 = vsub.s32 0, %v2409_v62 }
 0x20a   : > { %v2497_v11 = vpop.xlane.xlu0 %807 }
 0x20b   : > { %3008 = vst [vmem:[#allocation60_spill] sm:$0xff] %v2497_v11  ;;  %v889_v36 = vsel %vm864_vm1, %v2497_v11, -1e+30  ;;  %vm3019_vm1 = vcmask 57344  }
 0x20c   : > { %v2499_v47 = vpop.xlane.xlu1 %809  ;;  %v929_v51 = vsel %vm896_vm0, %v889_v36, -inf }
 0x20d   : > { %3009 = vst [vmem:[#allocation61_spill] sm:$0xff] %v2499_v47  ;;  %v890_v1 = vsel %vm865_vm2, %v2499_v47, -1e+30  ;;  %v930_v60 = vmax.f32 %v922_v45, %v929_v51  ;;  %vm3020_vm2 = vmmov %vm3019_vm1 }
 0x20e   : > { %v931_v47 = vsel %vm896_vm0, %v890_v1, -inf  ;;  %v926_v1 = vmax.f32 %v918_v40, %v925_v25 }
 0x20f   : > { %v932_v37 = vmax.f32 %v924_v26, %v931_v47  ;;  %v952_v26 = vld [vmem:[#allocation2] sm:$0x1] }
 0x212   : > { %v2528_v35 = vpop.xlane.xlu0 %811 }
 0x213   : > { %3013 = vst [vmem:[#allocation62_spill] sm:$0xff] %v2528_v35  ;;  %v891_v33 = vsel %vm866_vm3, %v2528_v35, -1e+30 }
 0x214   : > { %v2530_v21 = vpop.xlane.xlu1 %813  ;;  %v933_v58 = vsel %vm896_vm0, %v891_v33, -inf }
 0x215   : > { %3014 = vst [vmem:[#allocation63_spill] sm:$0xff] %v2530_v21  ;;  %v892_v11 = vsel %vm867_vm4, %v2530_v21, -1e+30  ;;  %v934_v5 = vmax.f32 %v926_v1, %v933_v58 }
 0x216   : > { %v935_v6 = vsel %vm896_vm0, %v892_v11, -inf }
 0x217   : > { %v936_v36 = vmax.f32 %v928_v44, %v935_v6 }
 0x21a   : > { %v2556_v49 = vpop.xlane.xlu0 %815 }
 0x21b   : > { %3017 = vst [vmem:[#allocation64_spill] sm:$0xff] %v2556_v49  ;;  %v893_v35 = vsel %vm868_vm5, %v2556_v49, -1e+30 }
 0x21c   : > { %v2558_v41 = vpop.xlane.xlu1 %817 }
 0x21d   : > { %3018 = vst [vmem:[#allocation65_spill] sm:$0xff] %v2558_v41  ;;  %v894_v18 = vsel %vm869_vm7, %v2558_v41, -1e+30  ;;  %v937_v41 = vsel %vm896_vm0, %v893_v35, -inf }
 0x21e   : > { %v939_v54 = vsel %vm896_vm0, %v894_v18, -inf  ;;  %v938_v2 = vmax.f32 %v930_v60, %v937_v41 }
 0x21f   : > { %v940_v49 = vmax.f32 %v932_v37, %v939_v54 }
 0x221   : > { %v944_v47 = vmax.f32 %v938_v2, %v940_v49 }
 0x222   : > { %v2584_v21 = vpop.xlane.xlu0 %819 }
 0x223   : > { %v895_v52 = vsel %vm870_vm10, %v2584_v21, -1e+30 }
 0x224   : > { %v941_v29 = vsel %vm896_vm0, %v895_v52, -inf }
 0x225   : > { %v942_v33 = vmax.f32 %v934_v5, %v941_v29 }
 0x227   : > { %v943_v57 = vmax.f32 %v942_v33, %v936_v36 }
 0x229   : > { %v945_v11 = vmax.f32 %v943_v57, %v944_v47 }
 0x22b   : > { %v946_v18 = vrot.slane %v945_v11, 4 }
 0x22d   : > { %v947_v35 = vmax.f32 %v945_v11, %v946_v18 }
 0x22f   : > { %v948_v40 = vrot.slane %v947_v35, 2 }
 0x231   : > { %v949_v22 = vmax.f32 %v947_v35, %v948_v40 }
 0x233   : > { %v950_v25 = vrot.slane %v949_v22, 1 }
 0x235   : > { %v951_v51 = vmax.f32 %v949_v22, %v950_v25 }
 0x237   : > { %v953_v58 = vmax.f32 %v952_v26, %v951_v51 }
 0x239   : > { %958 = vst.msk [vmem:[#allocation2] sm:$0x1] %vm3019_vm1, %v953_v58  ;;  %v2592_v54 = vrot.slane %v953_v58, %v962_v56  ;;  %v954_v60 = vsub.f32 %v952_v26, %v953_v58 }
 0x23b   : > { %v966_v5 = vmul.f32 %v2592_v54, %v2262_v30  ;;  %v965_v49 = vmul.f32 %v2592_v54, %v2245_v15  ;;  %v968_v1 = vmul.f32 %v2592_v54, %v2275_v31  ;;  %v967_v37 = vmul.f32 %v2592_v54, %v2255_v24 }
 0x23c   : > { %v970_v6 = vmul.f32 %v2592_v54, %v2288_v46  ;;  %v969_v52 = vmul.f32 %v2592_v54, %v2267_v34  ;;  %v972_v24 = vmul.f32 %v2592_v54, %v2301_v55  ;;  %v971_v36 = vmul.f32 %v2592_v54, %v2280_v42 }
 0x23d   : > { %v993_v41 = vsel %vm896_vm0, %v966_v5, 0.0  ;;  %v990_v45 = vsel %vm896_vm0, %v965_v49, 0.0  ;;  %v999_v44 = vsel %vm896_vm0, %v968_v1, 0.0  ;;  %v996_v15 = vsel %vm896_vm0, %v967_v37, 0.0  ;;  %v2681_v37 = vpop.xlane.xlu0 %1069 }
 0x23e   : > { %994 = vadd.xlane.f32.xlu0 %v993_v41  ;;  %991 = vadd.xlane.f32.xlu1 %v990_v45  ;;  %v1005_v31 = vsel %vm896_vm0, %v970_v6, 0.0  ;;  %v1002_v29 = vsel %vm896_vm0, %v969_v52, 0.0  ;;  %v955_v46 = vmul.f32 1.442695, %v954_v60  ;;  %v1011_v34 = vsel %vm896_vm0, %v972_v24, 0.0 }
 0x23f   : > { %v1008_v2 = vsel %vm896_vm0, %v971_v36, 0.0  ;;  %v974_v33 = vmul.f32 %v2592_v54, %v2315_v3  ;;  %v973_v55 = vmul.f32 %v2592_v54, %v2293_v50  ;;  %v976_v57 = vmul.f32 %v2592_v54, %v2328_v14 }
 0x240   : > { %v1458_v30 = vld [vmem:[#allocation2] sm:$0x1]  ;;  %1793 = vpow2.f32 %v955_v46  ;;  %v975_v11 = vmul.f32 %v2592_v54, %v2306_v59  ;;  %v978_v50 = vmul.f32 %v2592_v54, %v2338_v23  ;;  %v977_v35 = vmul.f32 %v2592_v54, %v2320_v7 }
 0x241   : > { %1459 = vst.msk [vmem:[%s281_s27] sm:$0x1] %vm3020_vm2, %v1458_v30  ;;  %v1017_v47 = vsel %vm896_vm0, %v974_v33, 0.0  ;;  %v1014_v42 = vsel %vm896_vm0, %v973_v55, 0.0  ;;  %v1023_v3 = vsel %vm896_vm0, %v976_v57, 0.0  ;;  %v980_v25 = vmul.f32 %v2592_v54, %v2351_v39  ;;  %v2685_v30 = vpop.xlane.xlu0 %1075  ;;  %v3027_v55 = vld [vmem:[#allocation41_spill] sm:$0xff] }
 0x242   : > { %1000 = vadd.xlane.f32.xlu0 %v999_v44  ;;  %997 = vadd.xlane.f32.xlu1 %v996_v15  ;;  %v1020_v18 = vsel %vm896_vm0, %v975_v11, 0.0  ;;  %v1029_v14 = vsel %vm896_vm0, %v978_v50, 0.0  ;;  %v1026_v59 = vsel %vm896_vm0, %v977_v35, 0.0  ;;  %v979_v26 = vmul.f32 %v2592_v54, %v2333_v19 }
 0x243   : > { %v1035_v23 = vsel %vm896_vm0, %v980_v25, 0.0  ;;  %v982_v51 = vmul.f32 %v2592_v54, %v2346_v32  ;;  %v981_v39 = vmul.f32 %v2592_v54, %v2364_v61  ;;  %v984_v62 = vmul.f32 %v2592_v54, %v2359_v53 }
 0x244   : > { %v983_v63 = vmul.f32 %v2592_v54, %v2377_v20  ;;  %v986_v61 = vmul.f32 %v2592_v54, %v2372_v8  ;;  %v985_v5 = vmul.f32 %v2592_v54, %v2390_v0  ;;  %v988_v20 = vmul.f32 %v2592_v54, %v2385_v43  ;;  %v2683_v43 = vpop.xlane.xlu1 %1066 }
 0x245   : > { %v1041_v19 = vsel %vm896_vm0, %v982_v51, 0.0  ;;  %v1038_v58 = vsel %vm896_vm0, %v981_v39, 0.0  ;;  %v1047_v60 = vsel %vm896_vm0, %v984_v62, 0.0  ;;  %v987_v41 = vmul.f32 %v2592_v54, %v2397_v17  ;;  %v2689_v44 = vpop.xlane.xlu0 %1081  ;;  %v3030_v51 = vld [vmem:[#allocation47_spill] sm:$0xff] }
 0x246   : > { %1006 = vadd.xlane.f32.xlu0 %v1005_v31  ;;  %1003 = vadd.xlane.f32.xlu1 %v1002_v29  ;;  %v1044_v32 = vsel %vm896_vm0, %v983_v63, 0.0  ;;  %v1053_v49 = vsel %vm896_vm0, %v986_v61, 0.0  ;;  %v1050_v53 = vsel %vm896_vm0, %v985_v5, 0.0  ;;  %v1059_v45 = vsel %vm896_vm0, %v988_v20, 0.0  ;;  %v3032_v61 = vld [vmem:[#allocation49_spill] sm:$0xff] }
 0x247   : > { %v1056_v8 = vsel %vm896_vm0, %v987_v41, 0.0  ;;  %v989_v0 = vmul.f32 %v2592_v54, %v2405_v9 }
 0x248   : > { %v2687_v17 = vpop.xlane.xlu1 %1072 }
 0x249   : > { %v1062_v1 = vsel %vm896_vm0, %v989_v0, 0.0  ;;  %v2693_v6 = vpop.xlane.xlu0 %1087  ;;  %v3034_v0 = vld [vmem:[#allocation51_spill] sm:$0xff] }
 0x24a   : > { %1012 = vadd.xlane.f32.xlu0 %v1011_v34  ;;  %1009 = vadd.xlane.f32.xlu1 %v1008_v2  ;;  %v1794_v40 = vpop.eup %1793 }
 0x24b   : > { %v1249_v22 = vrot.slane %v1794_v40, %v962_v56  ;;  %v1032_v56 = vsel %vm896_vm0, %v979_v26, 0.0 }
 0x24c   : > { %v2691_v15 = vpop.xlane.xlu1 %1078 }
 0x24d   : > { %v2650_v7 = vsel %vm3021_vm12, %v1249_v22, 0.0  ;;  %v2697_v54 = vpop.xlane.xlu0 %1093  ;;  %v3028_v22 = vld [vmem:[#allocation45_spill] sm:$0xff] }
 0x24e   : > { %1018 = vadd.xlane.f32.xlu0 %v1017_v47  ;;  %1015 = vadd.xlane.f32.xlu1 %v1014_v42  ;;  %v1252_v47 = vsel %vm896_vm0, %v2650_v7, 0.0  ;;  %vm1401_vm0 = vcmask 588800  }
 0x250   : > { %v2695_v9 = vpop.xlane.xlu1 %1084 }
 0x251   : > { %v2703_v24 = vpop.xlane.xlu0 %1099 }
 0x252   : > { %1024 = vadd.xlane.f32.xlu0 %v1023_v3  ;;  %1021 = vadd.xlane.f32.xlu1 %v1020_v18 }
 0x254   : > { %v2701_v52 = vpop.xlane.xlu1 %1090 }
 0x255   : > { %v2710_v29 = vpop.xlane.xlu0 %1105 }
 0x256   : > { %1030 = vadd.xlane.f32.xlu0 %v1029_v14  ;;  %1027 = vadd.xlane.f32.xlu1 %v1026_v59  ;;  %v3029_v59 = vld [vmem:[#allocation44_spill] sm:$0xff] }
 0x258   : > { %v2708_v31 = vpop.xlane.xlu1 %1096 }
 0x25a   : > { %1036 = vadd.xlane.f32.xlu0 %v1035_v23  ;;  %1033 = vadd.xlane.f32.xlu1 %v1032_v56 }
 0x25c   : > { %v2717_v46 = vpop.xlane.xlu1 %1102 }
 0x25e   : > { %1042 = vadd.xlane.f32.xlu0 %v1041_v19  ;;  %1039 = vadd.xlane.f32.xlu1 %v1038_v58  ;;  %v3031_v19 = vld [vmem:[#allocation46_spill] sm:$0xff] }
 0x260   : > { %v2723_v34 = vpop.xlane.xlu1 %1108 }
 0x262   : > { %1048 = vadd.xlane.f32.xlu0 %v1047_v60  ;;  %1045 = vadd.xlane.f32.xlu1 %v1044_v32 }
 0x266   : > { %1054 = vadd.xlane.f32.xlu0 %v1053_v49  ;;  %1051 = vadd.xlane.f32.xlu1 %v1050_v53  ;;  %v3033_v49 = vld [vmem:[#allocation48_spill] sm:$0xff] }
 0x26a   : > { %1060 = vadd.xlane.f32.xlu0 %v1059_v45  ;;  %1057 = vadd.xlane.f32.xlu1 %v1056_v8 }
 0x26e   : > { %1063 = vadd.xlane.f32.xlu1 %v1062_v1 }
 0x297   : > { %1369 = vxpose.xlu0.c.b16.start [1/8] (narrow) %v2241_v12, 16  ;;  %v3022_v12 = vld [vmem:[#allocation42_spill] sm:$0xff] }
 0x29b   : > { %1385 = vxpose.xlu1.c.b16.start [1/5] (short) (narrow) %v2343_v27, 16  ;;  %1370 = vxpose.xlu0.c.b16.cont [2/8] (narrow) %v2248_v16, 16  ;;  %v3023_v27 = vld [vmem:[#allocation43_spill] sm:$0xff]  ;;  %v2719_v16 = vpop.xlane.xlu0 %1111 }
 0x29c   : > { %v1662_v36 = vcombine.low %v3023_v27, %v3023_v27 }
 0x29f   : > { %1386 = vxpose.xlu1.c.b16.cont [2/5] (short) (narrow) %v2356_v48, 16  ;;  %1371 = vxpose.xlu0.c.b16.cont [3/8] (narrow) %v2259_v28, 16  ;;  %v3024_v48 = vld [vmem:[#allocation38_spill] sm:$0xff]  ;;  %v3025_v28 = vld [vmem:[#allocation39_spill] sm:$0xff]  ;;  %v2725_v2 = vpop.xlane.xlu0 %1114 }
 0x2a3   : > { %1387 = vxpose.xlu1.c.b16.cont [3/5] (short) (narrow) %v2369_v4, 16  ;;  %1372 = vxpose.xlu0.c.b16.cont [4/8] (narrow) %v2272_v38, 16  ;;  %v3026_v4 = vld [vmem:[#allocation40_spill] sm:$0xff]  ;;  %v2728_v38 = vpop.xlane.xlu1 %1117  ;;  %v2730_v33 = vpop.xlane.xlu0 %1120 }
 0x2a7   : > { %1388 = vxpose.xlu1.c.b16.cont [4/5] (short) (narrow) %v3022_v12, 16  ;;  %1373 = vxpose.xlu0.c.b16.cont [5/8] (narrow) %v3024_v48, 16  ;;  %v2735_v42 = vpop.xlane.xlu1 %1123  ;;  %v2737_v57 = vpop.xlane.xlu0 %1126  ;;  %v3035_v12 = vld [vmem:[#allocation50_spill] sm:$0xff] }
 0x2ab   : > { %1389 = vxpose.xlu1.c.b16.end [5/5] (short) (narrow) %v1662_v36, 16  ;;  %1374 = vxpose.xlu0.c.b16.cont [6/8] (narrow) %v3025_v28, 16  ;;  %v2739_v11 = vpop.xlane.xlu1 %1129  ;;  %v2741_v3 = vpop.xlane.xlu0 %1132 }
 0x2af   : > { %1375 = vxpose.xlu0.c.b16.cont [7/8] (narrow) %v3026_v4, 16  ;;  %v2743_v18 = vpop.xlane.xlu1 %1135  ;;  %v2745_v50 = vpop.xlane.xlu0 %1138 }
 0x2b3   : > { %1376 = vxpose.xlu0.c.b16.end [8/8] (narrow) %v3027_v55, 16  ;;  %v3036_v55 = vld [vmem:[#allocation13_spill] sm:$0xff] }
 0x2b8   : > { %1253 = vadd.xlane.f32.xlu1 %v1252_v47  ;;  %v690_v47 = vmax.f32 %v3036_v55, 0.0 }
 0x2cb   : > { %v995_v35 = vpop.xlane.xlu0 %994  ;;  %v992_v40 = vpop.xlane.xlu1 %991 }
 0x2cc   : > { %v1141_v14 = vsub.f32 %v3028_v22, %v995_v35  ;;  %v1140_v25 = vsub.f32 %v3029_v59, %v992_v40  ;;  %v3037_v35 = vld [vmem:[#allocation14_spill] sm:$0xff] }
 0x2cd   : > { %v692_v40 = vmax.f32 %v3037_v35, 0.0 }
 0x2ce   : > { %v1167_v26 = vmul.f32 1.442695, %v1141_v14  ;;  %v1165_v7 = vmul.f32 1.442695, %v1140_v25  ;;  %v3038_v25 = vld [vmem:[#allocation53_spill] sm:$0xff] }
 0x2cf   : > { %v1001_v23 = vpop.xlane.xlu0 %1000  ;;  %v998_v56 = vpop.xlane.xlu1 %997 }
 0x2d0   : > { %1795 = vpow2.f32 %v1167_v26  ;;  %v1143_v39 = vsub.f32 %v3030_v51, %v1001_v23  ;;  %v1142_v58 = vsub.f32 %v3031_v19, %v998_v56 }
 0x2d1   : > { %1797 = vpow2.f32 %v1165_v7  ;;  %v3039_v7 = vld [vmem:[#allocation52_spill] sm:$0xff] }
 0x2d2   : > { %v1171_v62 = vmul.f32 1.442695, %v1143_v39  ;;  %v1169_v63 = vmul.f32 1.442695, %v1142_v58 }
 0x2d3   : > { %v1007_v60 = vpop.xlane.xlu0 %1006  ;;  %v1004_v32 = vpop.xlane.xlu1 %1003 }
 0x2d4   : > { %1799 = vpow2.f32 %v1171_v62  ;;  %v1145_v5 = vsub.f32 %v3032_v61, %v1007_v60  ;;  %v1144_v53 = vsub.f32 %v3033_v49, %v1004_v32  ;;  %v3040_v60 = vld [vmem:[#allocation16_spill] sm:$0xff]  ;;  %v3041_v49 = vld [vmem:[#allocation55_spill] sm:$0xff] }
 0x2d5   : > { %1801 = vpow2.f32 %v1169_v63  ;;  %v696_v32 = vmax.f32 %v3040_v60, 0.0 }
 0x2d6   : > { %v1175_v20 = vmul.f32 1.442695, %v1145_v5  ;;  %v1173_v41 = vmul.f32 1.442695, %v1144_v53 }
 0x2d7   : > { %v1013_v45 = vpop.xlane.xlu0 %1012  ;;  %v1010_v8 = vpop.xlane.xlu1 %1009 }
 0x2d8   : > { %1803 = vpow2.f32 %v1175_v20  ;;  %v1147_v1 = vsub.f32 %v3034_v0, %v1013_v45  ;;  %v1146_v27 = vsub.f32 %v3035_v12, %v1010_v8  ;;  %v3042_v20 = vld [vmem:[#allocation54_spill] sm:$0xff] }
 0x2d9   : > { %1805 = vpow2.f32 %v1173_v41 }
 0x2da   : > { %v1796_v36 = vpop.eup %1795  ;;  %v1179_v48 = vmul.f32 1.442695, %v1147_v1  ;;  %v1177_v28 = vmul.f32 1.442695, %v1146_v27 }
 0x2db   : > { %v1798_v4 = vpop.eup %1797  ;;  %v1019_v22 = vpop.xlane.xlu0 %1018  ;;  %v1216_v59 = vmul.f32 %v1796_v36, %v2681_v37 }
 0x2dc   : > { %v1016_v14 = vpop.xlane.xlu1 %1015  ;;  %1807 = vpow2.f32 %v1179_v48  ;;  %v1149_v26 = vsub.f32 %v3038_v25, %v1019_v22  ;;  %v1215_v56 = vmul.f32 %v1798_v4, %v2683_v43  ;;  %v3043_v43 = vld [vmem:[#allocation15_spill] sm:$0xff] }
 0x2dd   : > { %v1148_v23 = vsub.f32 %v3039_v7, %v1016_v14  ;;  %1809 = vpow2.f32 %v1177_v28  ;;  %v1256_v51 = vmul.f32 %v1216_v59, %v692_v40  ;;  %v694_v8 = vmax.f32 %v3043_v43, 0.0  ;;  %v3044_v28 = vld [vmem:[#allocation17_spill] sm:$0xff] }
 0x2de   : > { %v1800_v39 = vpop.eup %1799  ;;  %v1183_v19 = vmul.f32 1.442695, %v1149_v26  ;;  %v1255_v62 = vmul.f32 %v1215_v56, %v690_v47  ;;  %v698_v4 = vmax.f32 %v3044_v28, 0.0  ;;  %v3046_v40 = vmov 0   ;;  %v3053_v28 = vld [vmem:[#allocation59_spill] sm:$0xff] }
 0x2df   : > { %v1181_v58 = vmul.f32 1.442695, %v1148_v23  ;;  %v1802_v63 = vpop.eup %1801  ;;  %v1025_v61 = vpop.xlane.xlu0 %1024  ;;  %v1218_v37 = vmul.f32 %v1800_v39, %v2685_v30  ;;  %v3045_v30 = vld [vmem:[#allocation18_spill] sm:$0xff] }
 0x2e0   : > { %v1022_v5 = vpop.xlane.xlu1 %1021  ;;  %1811 = vpow2.f32 %v1183_v19  ;;  %v1151_v53 = vsub.f32 %v3041_v49, %v1025_v61  ;;  %v1280_v45 = vpack.c.bf16 %v1256_v51, %v1255_v62  ;;  %v1217_v0 = vmul.f32 %v1802_v63, %v2687_v17 }
 0x2e1   : > { %v1150_v41 = vsub.f32 %v3042_v20, %v1022_v5  ;;  %1813 = vpow2.f32 %v1181_v58  ;;  %v1258_v1 = vmul.f32 %v1218_v37, %v696_v32  ;;  %v700_v55 = vmax.f32 %v3045_v30, 0.0  ;;  %v3047_v58 = vld [vmem:[#allocation20_spill] sm:$0xff]  ;;  %v3050_v5 = vld [vmem:[#allocation19_spill] sm:$0xff]  ;;  %v3054_v30 = vld [vmem:[#allocation58_spill] sm:$0xff] }
 0x2e2   : > { %v1804_v12 = vpop.eup %1803  ;;  %v1187_v27 = vmul.f32 1.442695, %v1151_v53  ;;  %1410 = vmatpush1.bf16.msra.mxu1 %v1280_v45  ;;  %v1257_v22 = vmul.f32 %v1217_v0, %v694_v8  ;;  %v704_v62 = vmax.f32 %v3047_v58, 0.0  ;;  %v3049_v32 = vld [vmem:[#allocation56_spill] sm:$0xff]  ;;  %v702_v37 = vmax.f32 %v3050_v5, 0.0  ;;  %v3051_v8 = vld [vmem:[#allocation21_spill] sm:$0xff] }
 0x2e3   : > { %v1185_v36 = vmul.f32 1.442695, %v1150_v41  ;;  %v1806_v48 = vpop.eup %1805  ;;  %v1031_v47 = vpop.xlane.xlu0 %1030  ;;  %1411 = vmatprep.subr.bf16.mxu1 %v3046_v40  ;;  %v1220_v14 = vmul.f32 %v1804_v12, %v2689_v44  ;;  %v3052_v0 = vld [vmem:[#allocation22_spill] sm:$0xff] }
 0x2e4   : > { %v1028_v35 = vpop.xlane.xlu1 %1027  ;;  %1815 = vpow2.f32 %v1187_v27  ;;  %v1153_v17 = vsub.f32 %v2441_v13, %v1031_v47  ;;  %v1219_v25 = vmul.f32 %v1806_v48, %v2691_v15  ;;  %v1281_v26 = vpack.c.bf16 %v1258_v1, %v1257_v22  ;;  %v3048_v13 = vld [vmem:[#allocation57_spill] sm:$0xff]  ;;  %v3060_v5 = vld [vmem:[#allocation26_spill] sm:$0xff] }
 0x2e5   : > { %v1152_v59 = vsub.f32 %v2439_v10, %v1028_v35  ;;  %1817 = vpow2.f32 %v1185_v36  ;;  %v1260_v7 = vmul.f32 %v1220_v14, %v700_v55  ;;  %v708_v1 = vmax.f32 %v3052_v0, 0.0 }
 0x2e6   : > { %v1808_v23 = vpop.eup %1807  ;;  %v1191_v56 = vmul.f32 1.442695, %v1153_v17  ;;  %v1259_v39 = vmul.f32 %v1219_v25, %v698_v4  ;;  %1412 = vmatpush1.bf16.msra.mxu1 %v1281_v26  ;;  %v3055_v26 = vld [vmem:[#allocation24_spill] sm:$0xff] }
 0x2e7   : > { %v1189_v51 = vmul.f32 1.442695, %v1152_v59  ;;  %v1810_v19 = vpop.eup %1809  ;;  %v1037_v63 = vpop.xlane.xlu0 %1036  ;;  %v1222_v60 = vmul.f32 %v1808_v23, %v2693_v6  ;;  %1413 = vmatprep.subr.bf16.mxu1 %v3046_v40  ;;  %v706_v6 = vmax.f32 %v3051_v8, 0.0  ;;  %v3062_v8 = vld [vmem:[#allocation62_spill] sm:$0xff] }
 0x2e8   : > { %v1034_v44 = vpop.xlane.xlu1 %1033  ;;  %1819 = vpow2.f32 %v1191_v56  ;;  %v1155_v10 = vsub.f32 %v3048_v13, %v1037_v63  ;;  %v1282_v61 = vpack.c.bf16 %v1260_v7, %v1259_v39  ;;  %v1221_v49 = vmul.f32 %v1810_v19, %v2695_v9  ;;  %v3057_v19 = vld [vmem:[#allocation60_spill] sm:$0xff] }
 0x2e9   : > { %v1154_v15 = vsub.f32 %v3049_v32, %v1034_v44  ;;  %1821 = vpow2.f32 %v1189_v51  ;;  %v1262_v53 = vmul.f32 %v1222_v60, %v704_v62  ;;  %v712_v7 = vmax.f32 %v3055_v26, 0.0  ;;  %v3056_v51 = vld [vmem:[#allocation61_spill] sm:$0xff]  ;;  %v3058_v62 = vld [vmem:[#allocation23_spill] sm:$0xff] }
 0x2ea   : > { %v1812_v20 = vpop.eup %1811  ;;  %v1195_v41 = vmul.f32 1.442695, %v1155_v10  ;;  %1414 = vmatpush1.bf16.msra.mxu1 %v1282_v61  ;;  %v1261_v36 = vmul.f32 %v1221_v49, %v702_v37  ;;  %v710_v63 = vmax.f32 %v3058_v62, 0.0  ;;  %v3059_v61 = vld [vmem:[#allocation25_spill] sm:$0xff]  ;;  %v716_v37 = vmax.f32 %v3060_v5, 0.0  ;;  %v3070_v5 = vld [vmem:[#allocation31_spill] sm:$0xff] }
 0x2eb   : > { %v1193_v45 = vmul.f32 1.442695, %v1154_v15  ;;  %v1814_v43 = vpop.eup %1813  ;;  %v1043_v12 = vpop.xlane.xlu0 %1042  ;;  %v1224_v48 = vmul.f32 %v1812_v20, %v2697_v54  ;;  %1415 = vmatprep.subr.bf16.mxu1 %v3046_v40 }
 0x2ec   : > { %v1040_v27 = vpop.xlane.xlu1 %1039  ;;  %1823 = vpow2.f32 %v1195_v41  ;;  %v1157_v4 = vsub.f32 %v3053_v28, %v1043_v12  ;;  %v1223_v55 = vmul.f32 %v1814_v43, %v2701_v52  ;;  %v1283_v47 = vpack.c.bf16 %v1262_v53, %v1261_v36 }
 0x2ed   : > { %v1156_v9 = vsub.f32 %v3054_v30, %v1040_v27  ;;  %1825 = vpow2.f32 %v1193_v45  ;;  %v1264_v35 = vmul.f32 %v1224_v48, %v708_v1  ;;  %v3061_v45 = vld [vmem:[#allocation63_spill] sm:$0xff] }
 0x2ee   : > { %v1816_v22 = vpop.eup %1815  ;;  %v1199_v14 = vmul.f32 1.442695, %v1157_v4  ;;  %v1263_v59 = vmul.f32 %v1223_v55, %v706_v6  ;;  %1416 = vmatpush1.bf16.msra.mxu1 %v1283_v47  ;;  %v3063_v4 = vld [vmem:[#allocation28_spill] sm:$0xff]  ;;  %v3064_v47 = vld [vmem:[#allocation65_spill] sm:$0xff] }
 0x2ef   : > { %v1197_v17 = vmul.f32 1.442695, %v1156_v9  ;;  %v1818_v25 = vpop.eup %1817  ;;  %v1049_v54 = vpop.xlane.xlu0 %1048  ;;  %v1226_v56 = vmul.f32 %v1816_v22, %v2703_v24  ;;  %1417 = vmatprep.subr.bf16.mxu1 %v3046_v40  ;;  %v714_v24 = vmax.f32 %v3059_v61, 0.0  ;;  %v720_v30 = vmax.f32 %v3063_v4, 0.0  ;;  %v3065_v22 = vld [vmem:[#allocation64_spill] sm:$0xff] }
 0x2f0   : > { %v1046_v23 = vpop.xlane.xlu1 %1045  ;;  %1827 = vpow2.f32 %v1199_v14  ;;  %v1159_v39 = vsub.f32 %v3056_v51, %v1049_v54  ;;  %v1284_v58 = vpack.c.bf16 %v1264_v35, %v1263_v59  ;;  %v1225_v44 = vmul.f32 %v1818_v25, %v2708_v31  ;;  %v3067_v51 = vld [vmem:[#allocation30_spill] sm:$0xff]  ;;  %v3069_v61 = vld [vmem:[#allocation32_spill] sm:$0xff] }
 0x2f1   : > { %v1158_v52 = vsub.f32 %v3057_v19, %v1046_v23  ;;  %1829 = vpow2.f32 %v1197_v17  ;;  %v1266_v60 = vmul.f32 %v1226_v56, %v712_v7  ;;  %v3066_v17 = vld [vmem:[#allocation27_spill] sm:$0xff] }
 0x2f2   : > { %v1820_v13 = vpop.eup %1819  ;;  %v1203_v10 = vmul.f32 1.442695, %v1159_v39  ;;  %1418 = vmatpush1.bf16.msra.mxu1 %v1284_v58  ;;  %v1265_v20 = vmul.f32 %v1225_v44, %v710_v63  ;;  %v718_v59 = vmax.f32 %v3066_v17, 0.0  ;;  %v3068_v58 = vld [vmem:[#allocation29_spill] sm:$0xff] }
 0x2f3   : > { %v1201_v32 = vmul.f32 1.442695, %v1158_v52  ;;  %v1822_v15 = vpop.eup %1821  ;;  %v1055_v49 = vpop.xlane.xlu0 %1054  ;;  %v1228_v41 = vmul.f32 %v1820_v13, %v2710_v29  ;;  %1419 = vmatprep.subr.bf16.mxu1 %v3046_v40  ;;  %v722_v62 = vmax.f32 %v3068_v58, 0.0 }
 0x2f4   : > { %v1052_v53 = vpop.xlane.xlu1 %1051  ;;  %1831 = vpow2.f32 %v1203_v10  ;;  %v1161_v43 = vsub.f32 %v3061_v45, %v1055_v49  ;;  %v1227_v6 = vmul.f32 %v1822_v15, %v2717_v46  ;;  %v1285_v0 = vpack.c.bf16 %v1266_v60, %v1265_v20 }
 0x2f5   : > { %v1160_v31 = vsub.f32 %v3062_v8, %v1052_v53  ;;  %1833 = vpow2.f32 %v1201_v32  ;;  %v1268_v1 = vmul.f32 %v1228_v41, %v716_v37  ;;  %v726_v37 = vmax.f32 %v3070_v5, 0.0 }
 0x2f6   : > { %v1824_v12 = vpop.eup %1823  ;;  %v1207_v27 = vmul.f32 1.442695, %v1161_v43  ;;  %v1267_v48 = vmul.f32 %v1227_v6, %v714_v24  ;;  %1420 = vmatpush1.bf16.msra.mxu1 %v1285_v0  ;;  %v728_v24 = vmax.f32 %v3069_v61, 0.0  ;;  %v3071_v43 = vld [vmem:[#allocation34_spill] sm:$0xff] }
 0x2f7   : > { %v1205_v36 = vmul.f32 1.442695, %v1160_v31  ;;  %v1826_v28 = vpop.eup %1825  ;;  %v1061_v29 = vpop.xlane.xlu0 %1060  ;;  %v1230_v55 = vmul.f32 %v1824_v12, %v2719_v16  ;;  %1421 = vmatprep.subr.bf16.mxu1 %v3046_v40  ;;  %v724_v16 = vmax.f32 %v3067_v51, 0.0  ;;  %v732_v8 = vmax.f32 %v3071_v43, 0.0  ;;  %v3072_v31 = vld [vmem:[#allocation33_spill] sm:$0xff] }
 0x2f8   : > { %v1058_v9 = vpop.xlane.xlu1 %1057  ;;  %1835 = vpow2.f32 %v1207_v27  ;;  %v1163_v35 = vsub.f32 %v3064_v47, %v1061_v29  ;;  %v1286_v14 = vpack.c.bf16 %v1268_v1, %v1267_v48  ;;  %v1229_v25 = vmul.f32 %v1826_v28, %v2723_v34  ;;  %v3073_v48 = vld [vmem:[#allocation36_spill] sm:$0xff] }
 0x2f9   : > { %v1162_v46 = vsub.f32 %v3065_v22, %v1058_v9  ;;  %1837 = vpow2.f32 %v1205_v36  ;;  %v1270_v26 = vmul.f32 %v1230_v55, %v720_v30  ;;  %v730_v6 = vmax.f32 %v3072_v31, 0.0  ;;  %v3074_v30 = vld [vmem:[#allocation35_spill] sm:$0xff] }
 0x2fa   : > { %v1828_v7 = vpop.eup %1827  ;;  %v1211_v54 = vmul.f32 1.442695, %v1163_v35  ;;  %1422 = vmatpush1.bf16.msra.mxu1 %v1286_v14  ;;  %v1269_v19 = vmul.f32 %v1229_v25, %v718_v59  ;;  %v736_v28 = vmax.f32 %v3073_v48, 0.0  ;;  %v734_v29 = vmax.f32 %v3074_v30, 0.0  ;;  %v3075_v35 = vld [vmem:[#allocation37_spill] sm:$0xff] }
 0x2fb   : > { %v1209_v23 = vmul.f32 1.442695, %v1162_v46  ;;  %v1830_v56 = vpop.eup %1829  ;;  %v1232_v52 = vmul.f32 %v1828_v7, %v2728_v38  ;;  %1423 = vmatprep.subr.bf16.mxu1 %v3046_v40  ;;  %v738_v22 = vmax.f32 %v3075_v35, 0.0 }
 0x2fc   : > { %v1064_v39 = vpop.xlane.xlu1 %1063  ;;  %1839 = vpow2.f32 %v1211_v54  ;;  %v1231_v34 = vmul.f32 %v1830_v56, %v2725_v2  ;;  %v1287_v44 = vpack.c.bf16 %v1270_v26, %v1269_v19 }
 0x2fd   : > { %v1164_v63 = vsub.f32 %v2584_v21, %v1064_v39  ;;  %1841 = vpow2.f32 %v1209_v23  ;;  %v1272_v60 = vmul.f32 %v1232_v52, %v724_v16  ;;  %v1377_v59 = vpop.trf.xlu0 }
 0x2fe   : > { %v1832_v13 = vpop.eup %1831  ;;  %v1271_v32 = vmul.f32 %v1231_v34, %v722_v62  ;;  %1424 = vmatpush1.bf16.msra.mxu1 %v1287_v44 }
 0x2ff   : > { %v1213_v10 = vmul.f32 1.442695, %v1164_v63  ;;  %v1834_v15 = vpop.eup %1833  ;;  %v1234_v38 = vmul.f32 %v1832_v13, %v2735_v42  ;;  %1425 = vmatprep.subr.bf16.mxu1 %v3046_v40 }
 0x300   : > { %v1288_v21 = vpack.c.bf16 %v1272_v60, %v1271_v32  ;;  %v1233_v2 = vmul.f32 %v1834_v15, %v2730_v33 }
 0x301   : > { %1843 = vpow2.f32 %v1213_v10  ;;  %v1274_v49 = vmul.f32 %v1234_v38, %v728_v24  ;;  %v1393_v53 = vpop.trf.xlu1 }
 0x302   : > { %v1836_v20 = vpop.eup %1835  ;;  %v1273_v41 = vmul.f32 %v1233_v2, %v726_v37  ;;  %1663 = vmatprep.mubr.msk.bf16.mxu1 %vm1401_vm0, %v1393_v53  ;;  %1426 = vmatpush1.bf16.msra.mxu1 %v1288_v21 }
 0x303   : > { %v1838_v45 = vpop.eup %1837  ;;  %v1236_v42 = vmul.f32 %v1836_v20, %v2739_v11  ;;  %1427 = vmatprep.subr.bf16.mxu1 %v3046_v40 }
 0x304   : > { %v1289_v0 = vpack.c.bf16 %v1274_v49, %v1273_v41  ;;  %v1235_v1 = vmul.f32 %v1838_v45, %v2737_v57 }
 0x305   : > { %v1276_v12 = vmul.f32 %v1236_v42, %v732_v8 }
 0x306   : > { %v1840_v33 = vpop.eup %1839  ;;  %v1275_v27 = vmul.f32 %v1235_v1, %v730_v6  ;;  %1428 = vmatpush1.bf16.msra.mxu1 %v1289_v0 }
 0x307   : > { %v1842_v36 = vpop.eup %1841  ;;  %v1238_v4 = vmul.f32 %v1840_v33, %v2743_v18  ;;  %1429 = vmatprep.subr.bf16.mxu1 %v3046_v40 }
 0x308   : > { %v1290_v11 = vpack.c.bf16 %v1276_v12, %v1275_v27  ;;  %v1237_v9 = vmul.f32 %v1842_v36, %v2741_v3 }
 0x309   : > { %v1278_v55 = vmul.f32 %v1238_v4, %v736_v28 }
 0x30a   : > { %v1277_v57 = vmul.f32 %v1237_v9, %v734_v29  ;;  %1430 = vmatpush1.bf16.msra.mxu1 %v1290_v11 }
 0x30b   : > { %v1844_v47 = vpop.eup %1843  ;;  %1431 = vmatprep.subr.bf16.mxu1 %v3046_v40 }
 0x30c   : > { %v1239_v46 = vmul.f32 %v1844_v47, %v2745_v50  ;;  %v1291_v18 = vpack.c.bf16 %v1278_v55, %v1277_v57 }
 0x30e   : > { %v1279_v14 = vmul.f32 %v1239_v46, %v738_v22  ;;  %1432 = vmatpush1.bf16.msra.mxu1 %v1291_v18 }
 0x30f   : > { %1433 = vmatprep.subr.bf16.mxu1 %v3046_v40 }
 0x310   : > { %v1292_v17 = vpack.c.bf16 %v1279_v14, %v1279_v14 }
 0x312   : > { %v1407_v3 = vsel %vm1405_vm13, %v1292_v17, 0 }
 0x313   : > { %1434 = vmatpush1.bf16.msra.mxu1 %v1407_v3 }
 0x316   : > { %1442 = vmatmul.mubr.bf16.vlgmr.msra.gmra.mrb[0].mxu1 %v1377_v59 }
 0x317   : > { %1886 = shalt.err (!%p1883_p6)
}
 0x318   : > { %s1887_s16 = scalar_lea.hbm %s2840_s7, 16  ;;  %s1891_s27 = scalar_lea.hbm %s2918_s5, 32 }
 0x319   : > { %p1888_p7 = scmp.ne.s32.totalorder %s2840_s7, %s1887_s16  ;;  %p1892_p0 = scmp.lt.u32.totalorder %s2840_s7, %s2918_s5 }
 0x31a   : > { %p1893_p2 = scmp.lt.u32.totalorder %s1891_s27, %s1887_s16  ;;  %p1895_p8 = scmp.lt.u32.totalorder %s1887_s16, %s2840_s7 }
 0x31b   : > { %p1889_p9 = pnand %p1888_p7, %p3076_p10 }
 0x31c   : > { %p1894_p4 = por %p1893_p2, %p1892_p0 }
 0x31d   : > { %p1890_p12 = pneg %p1889_p9 }
 0x31e   : > { %p1896_p11 = por %p1895_p8, %p1894_p4 }
 0x320   : > { %p1897_p13 = pnand %p1896_p11, %p1890_p12 }
 0x322   : > { %1900 = shalt.err (!%p1897_p13)
}
 0x323   : > { %1674 = dma.vmem_to_hbm [thread:$0]  (%p3076_p10), %s1492_s9, 16, %s2840_s7, %s1466_s8  }
 0x324   : > { %s1617_s13 = sshll.u32 %s2599_s25, 3  ;;  %s1665_s10 = sshll.u32 %s1979_s21, 7 }
 0x325   : > { %s275_s11 = scalar_lea.vmem [#allocation7], %s1617_s13  ;;  %s2865_s17 = scalar_lea.hbm %s2917_s4, %s1665_s10 }
 0x326   : > { %s1478_s14 = sshll.u32 %s275_s11, 4  ;;  %s1461_s21 = scalar_lea.sflag [#allocation6], %s2599_s25  ;;  %s2867_s14 = int_to_ptr.vmem [resolvable:$true] %s1478_s14 }
 0x327   : > { %s1901_s9 = scalar_lea.vmem %s2867_s14, 128  ;;  %s1995_s7 = smov [#allocation7]  }
 0x328   : > { %p1902_p1 = scmp.ne.s32.totalorder %s2867_s14, %s1901_s9  ;;  %s1905_s8 = sshll.u32 %s1995_s7, 4  ;;  %s1906_s8 = int_to_ptr.vmem [resolvable:$false] %s1905_s8 }
 0x329   : > { %s1907_s24 = scalar_lea.vmem %s1906_s8, 256  ;;  %p1908_p6 = scmp.lt.s32.totalorder %s2867_s14, %s1906_s8 }
 0x32a   : > { %p1903_p3 = pnand %p1902_p1, %p3076_p10  ;;  %p1909_p7 = scmp.lt.s32.totalorder %s1907_s24, %s1901_s9 }
 0x32c   : > { %p1904_p5 = pneg %p1903_p3  ;;  %p1910_p9 = por %p1909_p7, %p1908_p6 }
 0x32e   : > { %p1911_p12 = pnand %p1910_p9, %p1904_p5 }
 0x345   : > { %v1254_v50 = vpop.xlane.xlu1 %1253 }
 0x346   : > { %v1450_v40 = vmul.f32 0.0, %v1254_v50 }
 0x3e9   : > { %v1443_v25 = vpop.f32.mrb[0].mxu1 }
 0x3ea   : > { %v1451_v26 = vadd.f32 %v1450_v40, %v1443_v25  ;;  %v1445_v7 = vpop.f32.mrb[1].mxu1 }
 0x3eb   : > { %v1446_v54 = vpop.f32.mrb[2].mxu1 }
 0x3ec   : > { %1457 = vst [vmem:[%s275_s11] sm:$0xff] %v1451_v26  ;;  %v1447_v23 = vpop.f32.mrb[3].mxu1 }
 0x3ed   : > { %1914 = shalt.err (!%p1911_p12)
}
 0x3ee   : > { %s1915_s25 = scalar_lea.hbm %s2865_s17, 128  ;;  %s1919_s12 = scalar_lea.hbm %s2917_s4, 256 }
 0x3ef   : > { %p1916_p0 = scmp.ne.s32.totalorder %s2865_s17, %s1915_s25  ;;  %p1920_p8 = scmp.lt.u32.totalorder %s2865_s17, %s2917_s4 }
 0x3f0   : > { %p1921_p11 = scmp.lt.u32.totalorder %s1919_s12, %s1915_s25  ;;  %p1923_p1 = scmp.lt.u32.totalorder %s1915_s25, %s2865_s17 }
 0x3f1   : > { %p1917_p2 = pnand %p1916_p0, %p3076_p10 }
 0x3f2   : > { %p1922_p13 = por %p1921_p11, %p1920_p8 }
 0x3f3   : > { %p1918_p4 = pneg %p1917_p2 }
 0x3f4   : > { %p1924_p3 = por %p1923_p1, %p1922_p13 }
 0x3f6   : > { %p1925_p5 = pnand %p1924_p3, %p1918_p4 }
 0x3f8   : > { %1928 = shalt.err (!%p1925_p5)
}
 0x3f9   : > { %1673 = dma.vmem_to_hbm [thread:$0]  (%p3076_p10), %s2867_s14, 128, %s2865_s17, %s1461_s21  }
 0x3fa PF: > { %p1690_p6 = scmp.ge.s32.totalorder %s1987_s23, 2  ;;  %s1503_s11 = sand.u32 1, %s1967_s18  }
 0x3fb   : > { %p3077_p7 = scmp.ne.s32.totalorder %s2955_s30, 0  ;;  %s1504_s15 = scalar_lea.sflag [#allocation6], %s1503_s11 }
 0x3fd   : > { %p1682_p9 = pnand %p1690_p6, %p3077_p7 }
 0x3ff   : > { %1958 = dma.done.wait (!%p1682_p9), %s1504_s15, 128  }
 0x400   : > { %1960 = vsyncadd (!%p1682_p9), %s1504_s15, 4294967168  ;;  %s1513_s16 = scalar_lea.sflag [#allocation9], %s1503_s11 }
 0x401   : > { %1962 = dma.done.wait (!%p1682_p9), %s1513_s16, 16  }
 0x402   : > { %1964 = vsyncadd (!%p1682_p9), %s1513_s16, 4294967280  ;;  %s23_s23 = sadd.s32 1, %s1987_s23   ;;  %s3078_s18 = smov %s1971_s19 }
 0x403   : > { %p20_p12 = scmp.ge.s32.totalorder %s23_s23, 4   ;;  %s3079_s19 = smov %s1975_s20 }
 0x404   : > { %s3080_s20 = smov %s2079_s6  ;;  %s3081_s21 = smov %s1983_s22 }
 0x405   : > { %s3082_s22 = smov %s3084_s26  ;;  %22 = sbr.rel (!%p20_p12) target bundleno = 7 (0x7), region = 104 }
 0x40c   :  { %1517 = vsyncpa [#allocation5], 1 }
 0x40d   :  { %1519 = vsyncpa [#allocation5 + $0x1], 1 }
 0x40e   :  { %1520 = vsyncpa [#allocation6], 1 }
 0x40f   :  { %1522 = vsyncpa [#allocation6 + $0x1], 1 }
 0x410   :  { %1523 = vsyncpa [#allocation9], 1 }
 0x411   :  { %1525 = vsyncpa [#allocation9 + $0x1], 1 }

</bundles_post_ra>
